<compile_context>
chip_gen: v7x
topology: tpu7x:2x2x1
jax: 0.10.0
libtpu: 0.0.40
codegen_flags: <defaults>
</compile_context>

<pallas_src>
import functools

import jax
import jax.numpy as jnp
from jax.experimental import pallas as pl
from jax.experimental.pallas import tpu as pltpu


def _round_up(x, m):
    return (x + m - 1) // m * m


def _device_kind():
    try:
        return jax.devices()[0].device_kind.lower()
    except Exception:
        return ""


def gat_kernel(feat_d_ref, featT_ref, ft_ref, bias_ref, adj_ref, out_ref, *,
               num_heads, out_feats, in_feats, exp_dtype):
    d = feat_d_ref[...]                                    # (T, Fin)  bf16
    mask = adj_ref[...] != 0                               # (T, N)    bool
    ft = ft_ref[...]                                       # (N, HF)   bf16
    bias = bias_ref[...]                                   # (1, HF)   f32

    parts = []
    for h in range(num_heads):                             # static unroll
        # Scores for head h; attn_l*attn_r is pre-folded into featT_ref.
        e = jnp.dot(d, featT_ref[h * in_feats:(h + 1) * in_feats, :],
                    preferred_element_type=jnp.float32)    # (T, N) f32
        e = jnp.where(mask, e, -1e30)
        m = jnp.max(e, axis=-1, keepdims=True)
        # Masked entries are (-1e30 - m): exp underflows to exactly 0, so no
        # second select is needed (real dst rows have >=1 edge via self-loops;
        # padded all-masked rows yield finite garbage, sliced off later).
        p = jnp.exp((e - m).astype(exp_dtype))             # (T, N)
        denom = jnp.sum(p.astype(jnp.float32), axis=-1, keepdims=True)
        inv = pl.reciprocal(jnp.where(denom > 0.0, denom, 1.0), approx=True)
        # Aggregate un-normalised probs on the MXU, normalise the (T, Fout)
        # result (cheaper than scaling the whole (T, N) prob matrix).
        ft_h = ft[:, h * out_feats:(h + 1) * out_feats]    # (N, Fout) bf16
        r = jnp.dot(p.astype(jnp.bfloat16), ft_h,
                    preferred_element_type=jnp.float32) * inv
        parts.append(r)

    rst = jnp.concatenate(parts, axis=-1)                  # (T, HF)
    out_ref[...] = jnp.maximum(rst + bias, 0.0)            # one full-width store


def gat_forward(feat, adj_t_i8, w_t, attn_l, attn_r, bias, *, num_heads,
                out_feats, tile_dst=None, use_bf16_exp=None):
    """feat: (N, Fin) f32. adj_t_i8: (N, N) int8 with adj_t_i8[v, u] = 1 iff
    edge u -> v (destination-major). w_t: (Fin, H*Fout) f32 (transpose of the
    nn.Linear weight). attn_l/attn_r: (H, Fin). bias: (H*Fout,).
    Returns (N, H, Fout) f32."""
    N, Fin = feat.shape
    HF = num_heads * out_feats

    kind = _device_kind()
    if tile_dst is None:
        # v5e/v6e have 128 MiB VMEM -> larger dst strips; v7x/unknown: 128.
        tile_dst = 256 if ("v5" in kind or "v6" in kind) else 128
    if use_bf16_exp is None:
        # bf16 EUP/VPU paths exist on v6e/v7x only; keep f32 exp elsewhere.
        use_bf16_exp = ("v6" in kind) or ("v7" in kind)
    exp_dtype = jnp.bfloat16 if use_bf16_exp else jnp.float32

    # Tile the destination axis; pad N so every block is full.
    tile = min(tile_dst, _round_up(N, 32))
    n_pad = _round_up(N, tile)
    if n_pad != N:
        feat = jnp.pad(feat, ((0, n_pad - N), (0, 0)))
        adj_t_i8 = jnp.pad(adj_t_i8, ((0, n_pad - N), (0, n_pad - N)))

    # Hoisted projection: computed once (bf16 operands, f32 accumulate).
    ft = jnp.dot(feat.astype(jnp.bfloat16), w_t.astype(jnp.bfloat16),
                 preferred_element_type=jnp.float32).astype(jnp.bfloat16)
    # attn_l*attn_r folded into the resident src operand: (H*Fin, n_pad) bf16.
    scale = (attn_l * attn_r).astype(jnp.float32)                    # (H, Fin)
    featT_scaled = (scale[:, :, None] * feat.T[None, :, :]).astype(jnp.bfloat16)
    featT_scaled = featT_scaled.reshape(num_heads * Fin, n_pad)
    feat_d = feat.astype(jnp.bfloat16)                               # dst tiles

    kernel = functools.partial(gat_kernel, num_heads=num_heads,
                               out_feats=out_feats, in_feats=Fin,
                               exp_dtype=exp_dtype)
    out = pl.pallas_call(
        kernel,
        out_shape=jax.ShapeDtypeStruct((n_pad, HF), jnp.float32),
        grid=(n_pad // tile,),
        in_specs=[
            pl.BlockSpec((tile, Fin), lambda i: (i, 0)),               # dst feat tile (bf16)
            pl.BlockSpec((num_heads * Fin, n_pad), lambda i: (0, 0)),  # scaled feat^T (resident)
            pl.BlockSpec((n_pad, HF), lambda i: (0, 0)),               # projected ft (resident)
            pl.BlockSpec((1, HF), lambda i: (0, 0)),                   # bias
            pl.BlockSpec((tile, n_pad), lambda i: (i, 0)),             # int8 adjacency strip
        ],
        out_specs=pl.BlockSpec((tile, HF), lambda i: (i, 0)),
        compiler_params=pltpu.CompilerParams(
            dimension_semantics=("parallel",),
            vmem_limit_bytes=48 * 1024 * 1024),
    )(feat_d, featT_scaled, ft, bias.reshape(1, HF), adj_t_i8)
    return out[:N].reshape(N, num_heads, out_feats)


def gat_reference(feat, adj, w_t, attn_l, attn_r, bias, *, num_heads, out_feats):
    """Pure-JAX f32 reference of the PyTorch forward. adj is (src, dst) f32."""
    N = feat.shape[0]
    el = feat[:, None, :] * attn_l[None]                  # (N, H, Fin)
    er = feat[:, None, :] * attn_r[None]
    e = jnp.einsum('uhf,vhf->uvh', el, er)                # (Nsrc, Ndst, H)
    mask = adj[:, :, None] > 0
    e = jnp.where(mask, e, -1e30)
    e = e - jnp.max(e, axis=0, keepdims=True)
    p = jnp.exp(e) * adj[:, :, None]
    denom = jnp.sum(p, axis=0, keepdims=True)
    a = p / jnp.where(denom > 0, denom, 1.0)
    ft = (feat @ w_t).reshape(N, num_heads, out_feats)
    rst = jnp.einsum('uvh,uhd->vhd', a, ft)
    rst = rst + bias.reshape(1, num_heads, out_feats)
    return jnp.maximum(rst, 0.0)


if __name__ == "__main__":
    # num_heads is forced to 2 by the `repeat(1, 2)` in the reference module.
    # N is deliberately not a multiple of 128 to exercise padding.
    N, IN_FEATS, OUT_FEATS, NUM_HEADS = 200, 32, 16, 2

    key = jax.random.PRNGKey(0)
    k_feat, k_w, k_al, k_ar, k_adj = jax.random.split(key, 5)

    feat = jax.random.normal(k_feat, (N, IN_FEATS), dtype=jnp.float32)

    # Deterministic xavier-normal-like init (gain for relu = sqrt(2)).
    gain = jnp.sqrt(2.0)
    w_std = gain * jnp.sqrt(2.0 / (IN_FEATS + NUM_HEADS * OUT_FEATS))
    # nn.Linear weight is (H*Fout, Fin); we pass its transpose (Fin, H*Fout).
    w_t = w_std * jax.random.normal(
        k_w, (IN_FEATS, NUM_HEADS * OUT_FEATS), dtype=jnp.float32)
    a_std = gain * jnp.sqrt(2.0 / (NUM_HEADS + IN_FEATS))
    attn_l = a_std * jax.random.normal(k_al, (NUM_HEADS, IN_FEATS), jnp.float32)
    attn_r = a_std * jax.random.normal(k_ar, (NUM_HEADS, IN_FEATS), jnp.float32)
    bias = jnp.zeros((NUM_HEADS * OUT_FEATS,), dtype=jnp.float32)

    # Deterministic small graph: random edges + self-loops (no 0-in-degree).
    # NOTE: adjacency is treated as a binary 0/1 mask (matches the reference
    # for unweighted graphs; weighted edges would need the multiply form).
    adj_bool = jax.random.uniform(k_adj, (N, N)) < 0.4
    adj_bool = adj_bool | jnp.eye(N, dtype=bool)          # adj[u, v]: u -> v
    adj_f32 = adj_bool.astype(jnp.float32)                # (src, dst) for reference
    adj_t_i8 = adj_bool.T.astype(jnp.int8)                # (dst, src) int8 for kernel

    out = gat_forward(feat, adj_t_i8, w_t, attn_l, attn_r, bias,
                      num_heads=NUM_HEADS, out_feats=OUT_FEATS)
    out = jax.block_until_ready(out)

    ref = gat_reference(feat, adj_f32, w_t, attn_l, attn_r, bias,
                        num_heads=NUM_HEADS, out_feats=OUT_FEATS)
    assert out.shape == (N, NUM_HEADS, OUT_FEATS)
    # Tolerance accounts for bf16 MXU operands / bf16 exp / approx reciprocal;
    # softmax max & denominator statistics remain f32.
    max_err = float(jnp.max(jnp.abs(out - ref)))
    assert jnp.allclose(out, ref, atol=5e-2, rtol=5e-2), (
        f"mismatch vs reference (max abs err {max_err})")

    print("KERNEL_OK")
</pallas_src>

<mosaic_0001>
module attributes {stable_mosaic.version = 11 : i64} {
  func.func @gat_kernel(%arg0: i32, %arg1: memref<128x32xbf16, #tpu.memory_space<vmem>>, %arg2: memref<64x256xbf16, #tpu.memory_space<vmem>>, %arg3: memref<256x32xbf16, #tpu.memory_space<vmem>>, %arg4: memref<1x32xf32, #tpu.memory_space<vmem>>, %arg5: memref<128x256xi8, #tpu.memory_space<vmem>>, %arg6: memref<128x32xf32, #tpu.memory_space<vmem>>) attributes {dimension_semantics = [#tpu.dimension_semantics<parallel>], iteration_bounds = array<i64: 2>, scalar_prefetch = 0 : i64, scratch_operands = 0 : i64, tpu.core_type = #tpu.core_type<tc>, window_params = [{transform_indices = @transform_0, window_bounds = array<i64: 128, 32>}, {pipeline_mode = #tpu.pipeline_mode<synchronous>, transform_indices = @transform_1, window_bounds = array<i64: 64, 256>}, {pipeline_mode = #tpu.pipeline_mode<synchronous>, transform_indices = @transform_2, window_bounds = array<i64: 256, 32>}, {pipeline_mode = #tpu.pipeline_mode<synchronous>, transform_indices = @transform_3, window_bounds = array<i64: 1, 32>}, {transform_indices = @transform_4, window_bounds = array<i64: 128, 256>}, {transform_indices = @transform_5, window_bounds = array<i64: 128, 32>}]} {
    %c0 = arith.constant 0 : index
    %c0_0 = arith.constant 0 : index
    %0 = vector.load %arg1[%c0, %c0_0] : memref<128x32xbf16, #tpu.memory_space<vmem>>, vector<128x32xbf16>
    %c0_1 = arith.constant 0 : index
    %c0_2 = arith.constant 0 : index
    %1 = vector.load %arg5[%c0_1, %c0_2] : memref<128x256xi8, #tpu.memory_space<vmem>>, vector<128x256xi8>
    %c0_i8 = arith.constant 0 : i8
    %2 = vector.broadcast %c0_i8 : i8 to vector<128x256xi8>
    %3 = arith.cmpi ne, %1, %2 : vector<128x256xi8>
    %c0_3 = arith.constant 0 : index
    %c0_4 = arith.constant 0 : index
    %4 = vector.load %arg3[%c0_3, %c0_4] : memref<256x32xbf16, #tpu.memory_space<vmem>>, vector<256x32xbf16>
    %c0_5 = arith.constant 0 : index
    %c0_6 = arith.constant 0 : index
    %5 = vector.load %arg4[%c0_5, %c0_6] : memref<1x32xf32, #tpu.memory_space<vmem>>, vector<1x32xf32>
    %c0_7 = arith.constant 0 : index
    %c0_8 = arith.constant 0 : index
    %6 = vector.load %arg2[%c0_7, %c0_8] : memref<64x256xbf16, #tpu.memory_space<vmem>>, vector<32x256xbf16>
    %cst = arith.constant dense<0.000000e+00> : vector<128x256xf32>
    %7 = tpu.matmul %0, %6, %cst {dimension_numbers = #tpu.dot_dimension_numbers<[1], [0], [0], [1], [0, 0, 1, 1], [], []>} : vector<128x32xbf16>, vector<32x256xbf16>, vector<128x256xf32> -> vector<128x256xf32>
    %cst_9 = arith.constant -1.000000e+30 : f32
    %8 = vector.broadcast %cst_9 : f32 to vector<128x256xf32>
    %9 = arith.select %3, %7, %8 : vector<128x256xi1>, vector<128x256xf32>
    %cst_10 = arith.constant dense<0xFF800000> : vector<128xf32>
    %10 = vector.multi_reduction <maximumf>, %9, %cst_10 [1] : vector<128x256xf32> to vector<128xf32>
    %11 = vector.shape_cast %10 : vector<128xf32> to vector<128x1xf32>
    %12 = vector.broadcast %11 : vector<128x1xf32> to vector<128x256xf32>
    %13 = arith.subf %9, %12 : vector<128x256xf32>
    %14 = math.exp %13 : vector<128x256xf32>
    %cst_11 = arith.constant dense<0.000000e+00> : vector<128xf32>
    %15 = vector.multi_reduction <add>, %14, %cst_11 [1] : vector<128x256xf32> to vector<128xf32>
    %16 = vector.shape_cast %15 : vector<128xf32> to vector<128x1xf32>
    %cst_12 = arith.constant 0.000000e+00 : f32
    %17 = vector.broadcast %cst_12 : f32 to vector<128x1xf32>
    %18 = arith.cmpf ogt, %16, %17 : vector<128x1xf32>
    %cst_13 = arith.constant 1.000000e+00 : f32
    %19 = vector.broadcast %cst_13 : f32 to vector<128x1xf32>
    %20 = arith.select %18, %16, %19 : vector<128x1xi1>, vector<128x1xf32>
    %21 = tpu.reciprocal %20 {approx = true} : vector<128x1xf32> -> vector<128x1xf32>
    %22 = vector.extract_strided_slice %4 {offsets = [0, 0], sizes = [256, 16], strides = [1, 1]} : vector<256x32xbf16> to vector<256x16xbf16>
    %23 = arith.truncf %14 : vector<128x256xf32> to vector<128x256xbf16>
    %cst_14 = arith.constant dense<0.000000e+00> : vector<128x16xf32>
    %24 = tpu.matmul %23, %22, %cst_14 {dimension_numbers = #tpu.dot_dimension_numbers<[1], [0], [0], [1], [0, 0, 1, 1], [], []>} : vector<128x256xbf16>, vector<256x16xbf16>, vector<128x16xf32> -> vector<128x16xf32>
    %25 = vector.broadcast %21 : vector<128x1xf32> to vector<128x16xf32>
    %26 = arith.mulf %24, %25 : vector<128x16xf32>
    %c32 = arith.constant 32 : index
    %c0_15 = arith.constant 0 : index
    %27 = vector.load %arg2[%c32, %c0_15] : memref<64x256xbf16, #tpu.memory_space<vmem>>, vector<32x256xbf16>
    %cst_16 = arith.constant dense<0.000000e+00> : vector<128x256xf32>
    %28 = tpu.matmul %0, %27, %cst_16 {dimension_numbers = #tpu.dot_dimension_numbers<[1], [0], [0], [1], [0, 0, 1, 1], [], []>} : vector<128x32xbf16>, vector<32x256xbf16>, vector<128x256xf32> -> vector<128x256xf32>
    %cst_17 = arith.constant -1.000000e+30 : f32
    %29 = vector.broadcast %cst_17 : f32 to vector<128x256xf32>
    %30 = arith.select %3, %28, %29 : vector<128x256xi1>, vector<128x256xf32>
    %cst_18 = arith.constant dense<0xFF800000> : vector<128xf32>
    %31 = vector.multi_reduction <maximumf>, %30, %cst_18 [1] : vector<128x256xf32> to vector<128xf32>
    %32 = vector.shape_cast %31 : vector<128xf32> to vector<128x1xf32>
    %33 = vector.broadcast %32 : vector<128x1xf32> to vector<128x256xf32>
    %34 = arith.subf %30, %33 : vector<128x256xf32>
    %35 = math.exp %34 : vector<128x256xf32>
    %cst_19 = arith.constant dense<0.000000e+00> : vector<128xf32>
    %36 = vector.multi_reduction <add>, %35, %cst_19 [1] : vector<128x256xf32> to vector<128xf32>
    %37 = vector.shape_cast %36 : vector<128xf32> to vector<128x1xf32>
    %cst_20 = arith.constant 0.000000e+00 : f32
    %38 = vector.broadcast %cst_20 : f32 to vector<128x1xf32>
    %39 = arith.cmpf ogt, %37, %38 : vector<128x1xf32>
    %cst_21 = arith.constant 1.000000e+00 : f32
    %40 = vector.broadcast %cst_21 : f32 to vector<128x1xf32>
    %41 = arith.select %39, %37, %40 : vector<128x1xi1>, vector<128x1xf32>
    %42 = tpu.reciprocal %41 {approx = true} : vector<128x1xf32> -> vector<128x1xf32>
    %43 = vector.extract_strided_slice %4 {offsets = [0, 16], sizes = [256, 16], strides = [1, 1]} : vector<256x32xbf16> to vector<256x16xbf16>
    %44 = arith.truncf %35 : vector<128x256xf32> to vector<128x256xbf16>
    %cst_22 = arith.constant dense<0.000000e+00> : vector<128x16xf32>
    %45 = tpu.matmul %44, %43, %cst_22 {dimension_numbers = #tpu.dot_dimension_numbers<[1], [0], [0], [1], [0, 0, 1, 1], [], []>} : vector<128x256xbf16>, vector<256x16xbf16>, vector<128x16xf32> -> vector<128x16xf32>
    %46 = vector.broadcast %42 : vector<128x1xf32> to vector<128x16xf32>
    %47 = arith.mulf %45, %46 : vector<128x16xf32>
    %48 = tpu.concatenate %26, %47 in 1 : vector<128x16xf32>, vector<128x16xf32> -> vector<128x32xf32>
    %49 = vector.broadcast %5 : vector<1x32xf32> to vector<128x32xf32>
    %50 = arith.addf %48, %49 : vector<128x32xf32>
    %cst_23 = arith.constant 0.000000e+00 : f32
    %51 = vector.broadcast %cst_23 : f32 to vector<128x32xf32>
    %52 = arith.maximumf %50, %51 : vector<128x32xf32>
    %c0_24 = arith.constant 0 : index
    %c0_25 = arith.constant 0 : index
    %53 = vector.load %arg6[%c0_24, %c0_25] : memref<128x32xf32, #tpu.memory_space<vmem>>, vector<128x32xf32>
    tpu.vector_store %arg6[%c0_24, %c0_25], %52 {strides = array<i32>} : memref<128x32xf32, #tpu.memory_space<vmem>>, vector<128x32xf32>,
    return
  }
  func.func @transform_0(%arg0: i32) -> (i32, i32) {
    %c0_i32 = arith.constant 0 : i32
    %c0_i32_0 = arith.constant 0 : i32
    return %arg0, %c0_i32 : i32, i32
  }
  func.func @transform_1(%arg0: i32) -> (i32, i32) {
    %c0_i32 = arith.constant 0 : i32
    %c0_i32_0 = arith.constant 0 : i32
    %c0_i32_1 = arith.constant 0 : i32
    return %c0_i32, %c0_i32_0 : i32, i32
  }
  func.func @transform_2(%arg0: i32) -> (i32, i32) {
    %c0_i32 = arith.constant 0 : i32
    %c0_i32_0 = arith.constant 0 : i32
    %c0_i32_1 = arith.constant 0 : i32
    return %c0_i32, %c0_i32_0 : i32, i32
  }
  func.func @transform_3(%arg0: i32) -> (i32, i32) {
    %c0_i32 = arith.constant 0 : i32
    %c0_i32_0 = arith.constant 0 : i32
    %c0_i32_1 = arith.constant 0 : i32
    return %c0_i32, %c0_i32_0 : i32, i32
  }
  func.func @transform_4(%arg0: i32) -> (i32, i32) {
    %c0_i32 = arith.constant 0 : i32
    %c0_i32_0 = arith.constant 0 : i32
    return %arg0, %c0_i32 : i32, i32
  }
  func.func @transform_5(%arg0: i32) -> (i32, i32) {
    %c0_i32 = arith.constant 0 : i32
    %c0_i32_0 = arith.constant 0 : i32
    return %arg0, %c0_i32 : i32, i32
  }
}

</mosaic_0001>

<bundles_post_ra>
// kernel: tpu_custom_call.1
= control target key start
LH: loop header
LB: loop body
LE: loop exit
PB: predicated region body
PF: predicated region fallthrough
CT: control target
= control target key end

     0   :  { %s2467_s18 = smov 0   ;;  %s3545_s0 = inlined_call_operand.vmem [shape: bf16[256,32], index: 0, kind: input, shape index: {}]   ;;  %s3546_s1 = inlined_call_operand.vmem [shape: bf16[64,256], index: 1, kind: input, shape index: {}]   ;;  %s3547_s2 = inlined_call_operand.vmem [shape: bf16[256,32], index: 2, kind: input, shape index: {}]   ;;  %s3548_s3 = inlined_call_operand.vmem [shape: f32[1,32], index: 3, kind: input, shape index: {}]   ;;  %s3549_s4 = inlined_call_operand.vmem [shape: s8[256,256], index: 4, kind: input, shape index: {}]   ;;  %s3550_s5 = inlined_call_operand.vmem [shape: f32[256,32], index: 5, kind: output, shape index: {}]  }
   0x1 LB: > { %s1977_s19 = sadd.s32 4294967295, %s2432_s18   ;;  %p1981_p0 = scmp.ge.s32.totalorder %s2432_s18, 1  ;;  %s2432_s18 = sphi %s2467_s18, %s15_s18  }
   0x2   : > { %p200_p1 = scmp.lt.s32.totalorder %s2432_s18, 3 }
   0x4   : > { %p201_p2 = pnand %p1981_p0, %p200_p1 }
   0x6   : > { %204 = sbr.rel (%p201_p2) target bundleno = 1231 (0x4cf), region = 40 }
   0xd   : > { %v2196_v0 = vld [vmem:[%s3546_s1 + $0x4] ss:$8 sps:$4 sm:$0xff]   ;;  %s1982_s22 = sshll.u32 %s1977_s19, 4  ;;  %v2198_v1 = vld [vmem:[%s3546_s1] ss:$8 sps:$4 sm:$0xff]   ;;  %v3566_v2 = vmov 0  }
   0xe   : > { %442 = vmatprep.mubr.bf16.mxu0 %v3566_v2  ;;  %p235_p3 = scmp.lt.s32.totalorder %s1982_s22, 31  ;;  %410 = vmatprep.subr.bf16.mxu0 %v2196_v0  ;;  %v2199_v3 = vld [vmem:[%s3546_s1 + $0x14] ss:$8 sps:$4 sm:$0xff]   ;;  %v2201_v4 = vld [vmem:[%s3546_s1 + $0x10] ss:$8 sps:$4 sm:$0xff]   ;;  %vm3551_vm0 = vcmask 261120  }
   0xf   : > { %411 = vmatpush1.bf16.msra.mxu0 %v2198_v1  ;;  %v2536_v13 = vld [vmem:[%s3547_s2 + $0x40] sm:$0xff]   ;;  %s2435_s12 = smov 112   ;;  %v2212_v15 = vld [vmem:[%s3547_s2 + $0x48] sm:$0xff]   ;;  %v2556_v17 = vld [vmem:[%s3547_s2 + $0x50] sm:$0xff]   ;;  %s1984_s14 = sshll.u32 %s1977_s19, 2 }
  0x10   : > { %s3777_s22 = smov (!%p235_p3, %s1982_s22), 31  ;;  %412 = vmatprep.subr.bf16.mxu0 %v2199_v3  ;;  %v2211_v14 = vld [vmem:[%s3547_s2] sm:$0xff]   ;;  %2169 = vmatprep.subr.bf16.mxu1 %v2536_v13  ;;  %v2213_v16 = vld [vmem:[%s3547_s2 + $0x8] sm:$0xff]   ;;  %v2215_v18 = vld [vmem:[%s3547_s2 + $0x10] sm:$0xff]   ;;  %p241_p4 = scmp.lt.s32.totalorder %s1984_s14, 7 }
  0x11   : > { %s1983_s29 = sshll.u32 %s3777_s22, 2  ;;  %1613 = vrot.lane.b32.xlu1 %v2211_v14, %s2435_s12  ;;  %2177 = vmatpush3.bf16.msra.mxu1 %v2211_v14  ;;  %v2567_v19 = vld [vmem:[%s3547_s2 + $0x58] sm:$0xff]   ;;  %v2578_v21 = vld [vmem:[%s3547_s2 + $0x60] sm:$0xff]   ;;  %v2219_v23 = vld [vmem:[%s3547_s2 + $0x28] sm:$0xff]   ;;  %s1988_s17 = sshll.u32 %s3777_s22, 3 }
  0x12   : > { %s238_s7 = scalar_lea.vmem %s3545_s0, %s1983_s29  ;;  %2170 = vmatprep.subr.bf16.mxu1 %v2212_v15  ;;  %v2216_v20 = vld [vmem:[%s3547_s2 + $0x18] sm:$0xff]   ;;  %v2218_v22 = vld [vmem:[%s3547_s2 + $0x20] sm:$0xff]   ;;  %v2221_v24 = vld [vmem:[%s3547_s2 + $0x30] sm:$0xff]   ;;  %s3779_s14 = smov (!%p241_p4, %s1984_s14), 7 }
  0x13   : > { %413 = vmatpush1.bf16.msra.mxu0 %v2201_v4  ;;  %v2496_v5 = vld [vmem:[%s238_s7] sm:$0xff]   ;;  %v2501_v6 = vld [vmem:[%s238_s7 + $0x8] sm:$0xff]   ;;  %v2506_v7 = vld [vmem:[%s238_s7 + $0x10] sm:$0xff]   ;;  %s2040_s15 = sshll.u32 %s3779_s14, 4  ;;  %s3456_s21 = scalar_lea.vmem %s3550_s5, %s1988_s17 }
  0x14   : > { %v2511_v8 = vld [vmem:[%s238_s7 + $0x18] sm:$0xff]   ;;  %v2516_v9 = vld [vmem:[%s238_s7 + $0x20] sm:$0xff]   ;;  %v2521_v10 = vld [vmem:[%s238_s7 + $0x28] sm:$0xff]   ;;  %2041 = vmatprep.subr.bf16.mxu0 %v2536_v13  ;;  %s2607_s20 = scalar_lea.vmem %s3549_s4, %s2040_s15 }
  0x15   : > { %v2526_v11 = vld [vmem:[%s238_s7 + $0x30] sm:$0xff]   ;;  %v2531_v12 = vld [vmem:[%s238_s7 + $0x38] sm:$0xff]   ;;  %1631 = vrot.lane.b32.xlu1 %v2212_v15, %s2435_s12  ;;  %2178 = vmatpush3.bf16.msra.mxu1 %v2213_v16  ;;  %v2597_v25 = vld [vmem:[%s3547_s2 + $0x68] sm:$0xff]  }
  0x16   : > { %2001 = vmatmul.mubr.msk.bf16.vlgmr.msra.gmra.mrb[0].mxu0 %vm3551_vm0, %v2496_v5  ;;  %2171 = vmatprep.subr.bf16.mxu1 %v2556_v17  ;;  %v272_v26 = vld [vmem:[%s2607_s20] sm:$0xff]  ;;  %v273_v27 = vld [vmem:[%s2607_s20 + $0x8] sm:$0xff]  ;;  %v2223_v58 = vld [vmem:[%s3547_s2 + $0x70] sm:$0xff]  }
  0x17   : > { %452 = vmatprep.mubr.bf16.mxu0 %v3566_v2  ;;  %2042 = vmatpush3.bf16.msra.mxu0 %v2211_v14  ;;  %vm280_vm1 = vnez %v272_v26  ;;  %vm281_vm2 = vnez %v273_v27  ;;  %v2224_v59 = vld [vmem:[%s3547_s2 + $0x78] sm:$0xff]   ;;  %v2228_v4 = vld [vmem:[%s3546_s1 + $0x24] ss:$8 sps:$4 sm:$0xff]  }
  0x18   : > { %2043 = vmatprep.subr.bf16.mxu0 %v2212_v15  ;;  %v523_v28 = vsel %vm280_vm1, 16843009, %v3566_v2  ;;  %v524_v29 = vsel %vm281_vm2, 16843009, %v3566_v2  ;;  %v2225_v60 = vld [vmem:[%s3547_s2 + $0x38] sm:$0xff]  }
  0x19   : > { %1615 = vrot.lane.b32.xlu1 %v2213_v16, %s2435_s12  ;;  %2179 = vmatpush3.bf16.msra.mxu1 %v2215_v18  ;;  %v531_v30 = vunpack.c.0.s8 %v523_v28  ;;  %v532_v31 = vunpack.c.0.s8 %v524_v29  ;;  %v533_v32 = vunpack.c.1.s8 %v523_v28  ;;  %v534_v33 = vunpack.c.1.s8 %v524_v29 }
  0x1a   : > { %2172 = vmatprep.subr.bf16.mxu1 %v2567_v19  ;;  %v535_v61 = vunpack.c.2.s8 %v523_v28  ;;  %v536_v62 = vunpack.c.2.s8 %v524_v29  ;;  %v537_v1 = vunpack.c.3.s8 %v523_v28  ;;  %v538_v3 = vunpack.c.3.s8 %v524_v29 }
  0x1b   : > { %2044 = vmatpush3.bf16.msra.mxu0 %v2213_v16  ;;  %v563_v34 = vpack.c.b16 %v532_v31, %v531_v30  ;;  %v565_v35 = vpack.c.b16 %v534_v33, %v533_v32 }
  0x1c   : > { %2045 = vmatprep.subr.bf16.mxu0 %v2556_v17  ;;  %v567_v63 = vpack.c.b16 %v536_v62, %v535_v61 }
  0x1d   : > { %1617 = vrot.lane.b32.xlu1 %v2215_v18, %s2435_s12  ;;  %2180 = vmatpush3.bf16.msra.mxu1 %v2216_v20  ;;  %v564_v36 = vpack.c.b8 %v563_v34, %v563_v34  ;;  %v566_v37 = vpack.c.b8 %v565_v35, %v565_v35 }
  0x1e   : > { %2002 = vmatmul.mubr.msk.bf16.gmra.mrb[4].mxu0 %vm3551_vm0, %v2501_v6  ;;  %2173 = vmatprep.subr.bf16.mxu1 %v2578_v21  ;;  %v568_v0 = vpack.c.b8 %v567_v63, %v567_v63 }
  0x1f   : > { %462 = vmatprep.mubr.bf16.mxu0 %v3566_v2  ;;  %2046 = vmatpush3.bf16.msra.mxu0 %v2215_v18  ;;  %vm595_vm3 = vnez %v564_v36  ;;  %vm596_vm4 = vnez %v566_v37 }
  0x20   : > { %2047 = vmatprep.subr.bf16.mxu0 %v2567_v19  ;;  %v611_v38 = vsel %vm595_vm3, 16843009, %v3566_v2  ;;  %v612_v40 = vsel %vm596_vm4, 16843009, %v3566_v2  ;;  %vm597_vm9 = vnez %v568_v0 }
  0x21   : > { %1619 = vrot.lane.b32.xlu1 %v2216_v20, %s2435_s12  ;;  %2181 = vmatpush3.bf16.msra.mxu1 %v2218_v22  ;;  %v627_v39 = vunpack.c.0.s8 %v611_v38  ;;  %v628_v41 = vunpack.c.1.s8 %v611_v38  ;;  %v629_v42 = vunpack.c.0.s8 %v612_v40  ;;  %v630_v43 = vunpack.c.1.s8 %v612_v40 }
  0x22   : > { %2174 = vmatprep.subr.bf16.mxu1 %v2597_v25  ;;  %v613_v14 = vsel %vm597_vm9, 16843009, %v3566_v2 }
  0x23   : > { %2048 = vmatpush3.bf16.msra.mxu0 %v2216_v20  ;;  %vm2615_vm5 = vcmp.ne.s32.totalorder %v627_v39, 0  ;;  %vm2619_vm6 = vcmp.ne.s32.totalorder %v628_v41, 0  ;;  %vm2627_vm7 = vcmp.ne.s32.totalorder %v629_v42, 0  ;;  %vm2631_vm8 = vcmp.ne.s32.totalorder %v630_v43, 0  ;;  %v274_v20 = vld [vmem:[%s2607_s20 + $0x10] sm:$0xff] }
  0x24   : > { %2049 = vmatprep.subr.bf16.mxu0 %v2578_v21  ;;  %v631_v16 = vunpack.c.0.s8 %v613_v14  ;;  %vm282_vm13 = vnez %v274_v20 }
  0x25   : > { %1621 = vrot.lane.b32.xlu1 %v2218_v22, %s2435_s12  ;;  %2182 = vmatpush3.bf16.msra.mxu1 %v2219_v23  ;;  %v525_v32 = vsel %vm282_vm13, 16843009, %v3566_v2 }
  0x26   : > { %2003 = vmatmul.mubr.msk.bf16.gmra.mrb[8].mxu0 %vm3551_vm0, %v2506_v7  ;;  %2175 = vmatprep.subr.bf16.mxu1 %v2223_v58  ;;  %vm2674_vm10 = vcmp.ne.s32.totalorder %v631_v16, 0  ;;  %v539_v35 = vunpack.c.0.s8 %v525_v32  ;;  %v541_v36 = vunpack.c.1.s8 %v525_v32  ;;  %v545_v63 = vunpack.c.3.s8 %v525_v32 }
  0x27   : > { %472 = vmatprep.mubr.bf16.mxu0 %v3566_v2  ;;  %2050 = vmatpush3.bf16.msra.mxu0 %v2218_v22  ;;  %v275_v22 = vld [vmem:[%s2607_s20 + $0x18] sm:$0xff]  ;;  %v3615_v16 = vmov 0 }
  0x28   : > { %2051 = vmatprep.subr.bf16.mxu0 %v2597_v25  ;;  %vm283_vm14 = vnez %v275_v22 }
  0x29   : > { %1623 = vrot.lane.b32.xlu1 %v2219_v23, %s2435_s12  ;;  %2183 = vmatpush3.bf16.msra.mxu1 %v2221_v24  ;;  %v526_v34 = vsel %vm283_vm14, 16843009, %v3566_v2 }
  0x2a   : > { %2176 = vmatprep.subr.bf16.mxu1 %v2224_v59  ;;  %v540_v38 = vunpack.c.0.s8 %v526_v34  ;;  %v542_v39 = vunpack.c.1.s8 %v526_v34  ;;  %v544_v61 = vunpack.c.2.s8 %v526_v34 }
  0x2b   : > { %2052 = vmatpush3.bf16.msra.mxu0 %v2219_v23 }
  0x2c   : > { %2053 = vmatprep.subr.bf16.mxu0 %v2223_v58 }
  0x2d   : > { %1625 = vrot.lane.b32.xlu1 %v2221_v24, %s2435_s12  ;;  %2184 = vmatpush3.bf16.msra.mxu1 %v2225_v60 }
  0x2e   : > { %2004 = vmatmul.mubr.msk.bf16.gmra.mrb[12].mxu0 %vm3551_vm0, %v2511_v8 }
  0x2f   : > { %482 = vmatprep.mubr.bf16.mxu0 %v3566_v2  ;;  %2054 = vmatpush3.bf16.msra.mxu0 %v2221_v24 }
  0x30   : > { %2055 = vmatprep.subr.bf16.mxu0 %v2224_v59 }
  0x33   : > { %2056 = vmatpush3.bf16.msra.mxu0 %v2225_v60  ;;  %v543_v60 = vunpack.c.2.s8 %v525_v32 }
  0x34   : > { %1212 = vmatprep.subr.bf16.mxu0 %v2228_v4 }
  0x36   : > { %2005 = vmatmul.mubr.msk.bf16.gmra.mrb[16].mxu0 %vm3551_vm0, %v2516_v9 }
  0x37   : > { %492 = vmatprep.mubr.bf16.mxu0 %v3566_v2 }
  0x3e   : > { %2006 = vmatmul.mubr.msk.bf16.gmra.mrb[20].mxu0 %vm3551_vm0, %v2521_v10 }
  0x3f   : > { %502 = vmatprep.mubr.bf16.mxu0 %v3566_v2 }
  0x46   : > { %2007 = vmatmul.mubr.msk.bf16.gmra.mrb[24].mxu0 %vm3551_vm0, %v2526_v11 }
  0x47   : > { %512 = vmatprep.mubr.bf16.mxu0 %v3566_v2 }
  0x4e   : > { %2008 = vmatmul.mubr.msk.bf16.gmra.mrb[28].mxu0 %vm3551_vm0, %v2531_v12 }
  0xe9   : > { %v444_v46 = vpop.f32.mrb[0].mxu0 }
  0xea   : > { %v2625_v47 = vsel %vm2615_vm5, %v444_v46, -1e+30  ;;  %v446_v48 = vpop.f32.mrb[1].mxu0  ;;  %v571_v46 = vpack.c.b16 %v540_v38, %v539_v35 }
  0xeb   : > { %v2637_v51 = vsel %vm2619_vm6, %v446_v48, -1e+30  ;;  %v448_v52 = vpop.f32.mrb[2].mxu0 }
  0xec   : > { %v450_v53 = vpop.f32.mrb[3].mxu0  ;;  %v723_v54 = vmax.f32 %v2625_v47, %v2637_v51  ;;  %v2643_v55 = vsel %vm2627_vm7, %v448_v52, -1e+30  ;;  %v573_v52 = vpack.c.b16 %v542_v39, %v541_v36 }
  0xed   : > { %v2647_v56 = vsel %vm2631_vm8, %v450_v53, -1e+30 }
  0xee   : > { %724 = vmax.xlane.f32.xlu0 %v723_v54  ;;  %v726_v57 = vmax.f32 %v2643_v55, %v2647_v56  ;;  %v572_v54 = vpack.c.b8 %v571_v46, %v571_v46 }
  0xf0   : > { %vm599_vm2 = vnez %v572_v54 }
  0xf1   : > { %v454_v15 = vpop.f32.mrb[4].mxu0 }
  0xf2   : > { %727 = vmax.xlane.f32.xlu0 %v726_v57  ;;  %v574_v57 = vpack.c.b8 %v573_v52, %v573_v52 }
  0xf4   : > { %vm600_vm3 = vnez %v574_v57 }
  0xf5   : > { %v616_v62 = vsel %vm600_vm3, 16843009, %v3566_v2 }
  0xf6   : > { %v637_v0 = vunpack.c.0.s8 %v616_v62 }
  0xf8   : > { %vm2722_vm4 = vcmp.ne.s32.totalorder %v637_v0, 0 }
 0x108   : > { %1629 = vrot.lane.b32.xlu0 %v2536_v13, %s2435_s12  ;;  %v569_v13 = vpack.c.b16 %v538_v3, %v537_v1  ;;  %v638_v1 = vunpack.c.1.s8 %v616_v62  ;;  %v615_v3 = vsel %vm599_vm2, 16843009, %v3566_v2  ;;  %v3621_v62 = vmov 0 }
 0x109   : > { %v635_v20 = vunpack.c.0.s8 %v615_v3  ;;  %v636_v36 = vunpack.c.1.s8 %v615_v3 }
 0x10a   : > { %v570_v18 = vpack.c.b8 %v569_v13, %v569_v13  ;;  %v575_v13 = vpack.c.b16 %v544_v61, %v543_v60  ;;  %vm2726_vm9 = vcmp.ne.s32.totalorder %v638_v1, 0  ;;  %v3618_v61 = vmov 0 }
 0x10b   : > { %v3616_v16 = vsel %vm2726_vm9, 4294967295, %v3615_v16  ;;  %vm2746_vm3 = vcmp.ne.s32.totalorder %v635_v20, 0 }
 0x10c   : > { %1633 = vrot.lane.b32.xlu0 %v2556_v17, %s2435_s12  ;;  %v632_v17 = vunpack.c.1.s8 %v613_v14  ;;  %vm598_vm12 = vnez %v570_v18  ;;  %3617 = vst [vmem:[#allocation3_spill] sm:$0xff] %v3616_v16  ;;  %v3619_v61 = vsel %vm2746_vm3, 4294967295, %v3618_v61 }
 0x10d   : > { %v614_v27 = vsel %vm598_vm12, 16843009, %v3566_v2  ;;  %3620 = vst [vmem:[#allocation4_spill] sm:$0xff] %v3619_v61 }
 0x10e   : > { %vm2678_vm11 = vcmp.ne.s32.totalorder %v632_v17, 0  ;;  %v633_v29 = vunpack.c.0.s8 %v614_v27  ;;  %v634_v31 = vunpack.c.1.s8 %v614_v27 }
 0x110   : > { %1635 = vrot.lane.b32.xlu0 %v2567_v19, %s2435_s12  ;;  %v456_v19 = vpop.f32.mrb[5].mxu0  ;;  %vm2697_vm15 = vcmp.ne.s32.totalorder %v633_v29, 0  ;;  %vm2701_vm1 = vcmp.ne.s32.totalorder %v634_v31, 0  ;;  %v276_v29 = vld [vmem:[%s2607_s20 + $0x20] sm:$0xff] }
 0x111   : > { %v2688_v26 = vsel %vm2678_vm11, %v456_v19, -1e+30  ;;  %v458_v28 = vpop.f32.mrb[6].mxu0  ;;  %v576_v19 = vpack.c.b8 %v575_v13, %v575_v13  ;;  %vm284_vm13 = vnez %v276_v29  ;;  %v3627_v13 = vmov 0 }
 0x112   : > { %v460_v33 = vpop.f32.mrb[7].mxu0  ;;  %v2707_v40 = vsel %vm2697_vm15, %v458_v28, -1e+30  ;;  %v3633_v29 = vmov 0 }
 0x113   : > { %v2711_v41 = vsel %vm2701_vm1, %v460_v33, -1e+30  ;;  %v2713_v42 = vpop.f32.mrb[8].mxu0  ;;  %vm601_vm12 = vnez %v576_v19 }
 0x114   : > { %1637 = vrot.lane.b32.xlu0 %v2578_v21, %s2435_s12  ;;  %v2684_v21 = vsel %vm2674_vm10, %v454_v15, -1e+30  ;;  %v732_v43 = vmax.f32 %v2707_v40, %v2711_v41  ;;  %v2718_v48 = vpop.f32.mrb[9].mxu0  ;;  %v3612_v15 = vmov 0  ;;  %v617_v33 = vsel %vm601_vm12, 16843009, %v3566_v2 }
 0x115   : > { %v729_v30 = vmax.f32 %v2684_v21, %v2688_v26  ;;  %v468_v53 = vpop.f32.mrb[10].mxu0  ;;  %v3613_v15 = vsel %vm2722_vm4, 4294967295, %v3612_v15  ;;  %v639_v38 = vunpack.c.0.s8 %v617_v33  ;;  %v640_v57 = vunpack.c.1.s8 %v617_v33 }
 0x116   : > { %v470_v59 = vpop.f32.mrb[11].mxu0  ;;  %3614 = vst [vmem:[#allocation2_spill] sm:$0xff] %v3613_v15  ;;  %v2732_v18 = vsel %vm2722_vm4, %v468_v53, -1e+30 }
 0x117   : > { %730 = vmax.xlane.f32.xlu1 %v729_v30  ;;  %v474_v4 = vpop.f32.mrb[12].mxu0  ;;  %v2736_v22 = vsel %vm2726_vm9, %v470_v59, -1e+30  ;;  %v277_v30 = vld [vmem:[%s2607_s20 + $0x28] sm:$0xff]  ;;  %vm2781_vm0 = vcmp.ne.s32.totalorder %v640_v57, 0 }
 0x118   : > { %1639 = vrot.lane.b32.xlu0 %v2597_v25, %s2435_s12  ;;  %v476_v17 = vpop.f32.mrb[13].mxu0  ;;  %v738_v31 = vmax.f32 %v2732_v18, %v2736_v22  ;;  %vm285_vm14 = vnez %v277_v30  ;;  %v3634_v29 = vsel %vm2781_vm0, 4294967295, %v3633_v29 }
 0x119   : > { %v478_v27 = vpop.f32.mrb[14].mxu0  ;;  %v528_v35 = vsel %vm285_vm14, 16843009, %v3566_v2  ;;  %vm2766_vm14 = vcmp.ne.s32.totalorder %v636_v36, 0  ;;  %3635 = vst [vmem:[#allocation9_spill] sm:$0xff] %v3634_v29 }
 0x11a   : > { %v480_v32 = vpop.f32.mrb[15].mxu0  ;;  %v548_v53 = vunpack.c.0.s8 %v528_v35  ;;  %v550_v60 = vunpack.c.1.s8 %v528_v35  ;;  %v3628_v13 = vsel %vm2766_vm14, 4294967295, %v3627_v13  ;;  %v552_v36 = vunpack.c.2.s8 %v528_v35 }
 0x11b   : > { %733 = vmax.xlane.f32.xlu1 %v732_v43  ;;  %v484_v59 = vpop.f32.mrb[16].mxu0  ;;  %3629 = vst [vmem:[#allocation7_spill] sm:$0xff] %v3628_v13 }
 0x11c   : > { %1641 = vrot.lane.b32.xlu0 %v2223_v58, %s2435_s12  ;;  %v546_v58 = vunpack.c.3.s8 %v526_v34  ;;  %v527_v34 = vsel %vm284_vm13, 16843009, %v3566_v2  ;;  %v486_v3 = vpop.f32.mrb[17].mxu0 }
 0x11d   : > { %v547_v43 = vunpack.c.0.s8 %v527_v34  ;;  %v549_v54 = vunpack.c.1.s8 %v527_v34  ;;  %v488_v20 = vpop.f32.mrb[18].mxu0  ;;  %v551_v33 = vunpack.c.2.s8 %v527_v34 }
 0x11e   : > { %v577_v14 = vpack.c.b16 %v546_v58, %v545_v63  ;;  %v3624_v63 = vmov 0 }
 0x11f   : > { %739 = vmax.xlane.f32.xlu1 %v738_v31  ;;  %v579_v1 = vpack.c.b16 %v548_v53, %v547_v43  ;;  %v490_v31 = vpop.f32.mrb[19].mxu0  ;;  %v554_v43 = vunpack.c.3.s8 %v528_v35  ;;  %v583_v53 = vpack.c.b16 %v552_v36, %v551_v33 }
 0x120   : > { %v578_v28 = vpack.c.b8 %v577_v14, %v577_v14  ;;  %v3630_v14 = vmov 0 }
 0x121   : > { %v580_v30 = vpack.c.b8 %v579_v1, %v579_v1  ;;  %v278_v1 = vld [vmem:[%s2607_s20 + $0x30] sm:$0xff] }
 0x122   : > { %vm602_vm2 = vnez %v578_v28  ;;  %v2779_v28 = vsel %vm2746_vm3, %v2713_v42, -1e+30 }
 0x123   : > { %v618_v39 = vsel %vm602_vm2, 16843009, %v3566_v2  ;;  %vm2770_vm2 = vcmp.ne.s32.totalorder %v639_v38, 0  ;;  %v553_v38 = vunpack.c.3.s8 %v527_v34 }
 0x124   : > { %v641_v46 = vunpack.c.0.s8 %v618_v39  ;;  %v642_v52 = vunpack.c.1.s8 %v618_v39  ;;  %v3631_v14 = vsel %vm2770_vm2, 4294967295, %v3630_v14  ;;  %v2788_v39 = vsel %vm2766_vm14, %v2718_v48, -1e+30  ;;  %v494_v48 = vpop.f32.mrb[20].mxu0 }
 0x125   : > { %3632 = vst [vmem:[#allocation8_spill] sm:$0xff] %v3631_v14  ;;  %v2792_v42 = vsel %vm2770_vm2, %v474_v4, -1e+30  ;;  %v496_v35 = vpop.f32.mrb[21].mxu0 }
 0x126   : > { %vm2750_vm12 = vcmp.ne.s32.totalorder %v641_v46, 0  ;;  %vm2754_vm13 = vcmp.ne.s32.totalorder %v642_v52, 0  ;;  %v2796_v46 = vsel %vm2781_vm0, %v476_v17, -1e+30  ;;  %v3636_v17 = vmov 0  ;;  %v498_v33 = vpop.f32.mrb[22].mxu0 }
 0x127   : > { %v3622_v62 = vsel %vm2750_vm12, 4294967295, %v3621_v62  ;;  %v3625_v63 = vsel %vm2754_vm13, 4294967295, %v3624_v63  ;;  %v2760_v58 = vsel %vm2750_vm12, %v478_v27, -1e+30  ;;  %v2764_v0 = vsel %vm2754_vm13, %v480_v32, -1e+30 }
 0x128   : > { %3623 = vst [vmem:[#allocation5_spill] sm:$0xff] %v3622_v62  ;;  %3626 = vst [vmem:[#allocation6_spill] sm:$0xff] %v3625_v63  ;;  %v744_v19 = vmax.f32 %v2760_v58, %v2764_v0  ;;  %v581_v27 = vpack.c.b16 %v550_v60, %v549_v54  ;;  %vm603_vm13 = vnez %v580_v30  ;;  %v585_v60 = vpack.c.b16 %v554_v43, %v553_v38 }
 0x129   : > { %v619_v52 = vsel %vm603_vm13, 16843009, %v3566_v2  ;;  %v584_v30 = vpack.c.b8 %v583_v53, %v583_v53  ;;  %v3645_v53 = vmov 0  ;;  %v741_v63 = vmax.f32 %v2792_v42, %v2796_v46 }
 0x12a   : > { %745 = vmax.xlane.f32.xlu1 %v744_v19  ;;  %v582_v32 = vpack.c.b8 %v581_v27, %v581_v27  ;;  %v643_v34 = vunpack.c.0.s8 %v619_v52  ;;  %v644_v54 = vunpack.c.1.s8 %v619_v52  ;;  %v279_v19 = vld [vmem:[%s2607_s20 + $0x38] sm:$0xff]  ;;  %v586_v36 = vpack.c.b8 %v585_v60, %v585_v60 }
 0x12b   : > { %v3642_v52 = vmov 0 }
 0x12c   : > { %vm604_vm12 = vnez %v582_v32  ;;  %vm2802_vm9 = vcmp.ne.s32.totalorder %v643_v34, 0  ;;  %vm2806_vm13 = vcmp.ne.s32.totalorder %v644_v54, 0  ;;  %v3639_v32 = vmov 0 }
 0x12d   : > { %v620_v57 = vsel %vm604_vm12, 16843009, %v3566_v2  ;;  %v3637_v17 = vsel %vm2802_vm9, 4294967295, %v3636_v17  ;;  %v3640_v32 = vsel %vm2806_vm13, 4294967295, %v3639_v32  ;;  %v2812_v38 = vsel %vm2802_vm9, %v484_v59, -1e+30 }
 0x12e   : > { %v645_v4 = vunpack.c.0.s8 %v620_v57  ;;  %v646_v27 = vunpack.c.1.s8 %v620_v57  ;;  %3638 = vst [vmem:[#allocation10_spill] sm:$0xff] %v3637_v17  ;;  %3641 = vst [vmem:[#allocation11_spill] sm:$0xff] %v3640_v32  ;;  %v2816_v43 = vsel %vm2806_vm13, %v486_v3, -1e+30  ;;  %v735_v34 = vmax.f32 %v2779_v28, %v2788_v39  ;;  %v500_v3 = vpop.f32.mrb[23].mxu0 }
 0x12f   : > { %vm605_vm12 = vnez %v584_v30  ;;  %vm606_vm13 = vnez %v586_v36  ;;  %vm3648_vm9 = vnez %v278_v1  ;;  %v3650_v36 = vmov 0 }
 0x130   : > { %vm2818_vm2 = vcmp.ne.s32.totalorder %v645_v4, 0  ;;  %vm2822_vm0 = vcmp.ne.s32.totalorder %v646_v27, 0  ;;  %v621_v60 = vsel %vm605_vm12, 16843009, %v3566_v2  ;;  %v529_v4 = vsel %vm3648_vm9, 16843009, %v3566_v2 }
 0x131   : > { %v3643_v52 = vsel %vm2818_vm2, 4294967295, %v3642_v52  ;;  %v3646_v53 = vsel %vm2822_vm0, 4294967295, %v3645_v53  ;;  %v2830_v54 = vsel %vm2818_vm2, %v488_v20, -1e+30  ;;  %v2834_v59 = vsel %vm2822_vm0, %v490_v31, -1e+30 }
 0x132   : > { %3644 = vst [vmem:[#allocation12_spill] sm:$0xff] %v3643_v52  ;;  %3647 = vst [vmem:[#allocation13_spill] sm:$0xff] %v3646_v53  ;;  %v750_v57 = vmax.f32 %v2830_v54, %v2834_v59  ;;  %v647_v27 = vunpack.c.0.s8 %v621_v60  ;;  %v648_v32 = vunpack.c.1.s8 %v621_v60  ;;  %v622_v20 = vsel %vm606_vm13, 16843009, %v3566_v2 }
 0x133   : > { %vm3649_vm2 = vnez %v279_v19  ;;  %v649_v31 = vunpack.c.0.s8 %v622_v20  ;;  %v650_v30 = vunpack.c.1.s8 %v622_v20  ;;  %v555_v52 = vunpack.c.0.s8 %v529_v4 }
 0x134   : > { %v530_v53 = vsel %vm3649_vm2, 16843009, %v3566_v2  ;;  %751 = vmax.xlane.f32.xlu1 %v750_v57  ;;  %vm2846_vm12 = vcmp.ne.s32.totalorder %v647_v27, 0  ;;  %v557_v1 = vunpack.c.1.s8 %v529_v4  ;;  %v747_v62 = vmax.f32 %v2812_v38, %v2816_v43 }
 0x135   : > { %v556_v17 = vunpack.c.0.s8 %v530_v53  ;;  %v3651_v36 = vsel %vm2846_vm12, 4294967295, %v3650_v36  ;;  %v558_v60 = vunpack.c.1.s8 %v530_v53  ;;  %vm2852_vm9 = vcmp.ne.s32.totalorder %v648_v32, 0 }
 0x136   : > { %3652 = vst [vmem:[#allocation14_spill] sm:$0xff] %v3651_v36  ;;  %v3653_v19 = vmov 0  ;;  %vm2856_vm2 = vcmp.ne.s32.totalorder %v649_v31, 0  ;;  %v3656_v57 = vmov 0  ;;  %vm2860_vm13 = vcmp.ne.s32.totalorder %v650_v30, 0  ;;  %v504_v30 = vpop.f32.mrb[24].mxu0 }
 0x137   : > { %v3654_v19 = vsel %vm2852_vm9, 4294967295, %v3653_v19  ;;  %v3657_v57 = vsel %vm2856_vm2, 4294967295, %v3656_v57  ;;  %v2866_v27 = vsel %vm2846_vm12, %v494_v48, -1e+30  ;;  %v2870_v20 = vsel %vm2856_vm2, %v498_v33, -1e+30 }
 0x138   : > { %3655 = vst [vmem:[#allocation15_spill] sm:$0xff] %v3654_v19  ;;  %3658 = vst [vmem:[#allocation16_spill] sm:$0xff] %v3657_v57  ;;  %v2874_v32 = vsel %vm2860_vm13, %v500_v3, -1e+30  ;;  %v587_v31 = vpack.c.b16 %v556_v17, %v555_v52  ;;  %v589_v29 = vpack.c.b16 %v558_v60, %v557_v1  ;;  %v559_v14 = vunpack.c.2.s8 %v529_v4  ;;  %v506_v33 = vpop.f32.mrb[25].mxu0 }
 0x139   : > { %v756_v2 = vmax.f32 %v2870_v20, %v2874_v32  ;;  %v560_v16 = vunpack.c.2.s8 %v530_v53  ;;  %v2880_v48 = vsel %vm2852_vm9, %v496_v35, -1e+30  ;;  %v561_v36 = vunpack.c.3.s8 %v529_v4  ;;  %v508_v3 = vpop.f32.mrb[26].mxu0 }
 0x13a   : > { %v588_v57 = vpack.c.b8 %v587_v31, %v587_v31  ;;  %v562_v15 = vunpack.c.3.s8 %v530_v53  ;;  %v510_v52 = vpop.f32.mrb[27].mxu0  ;;  %v753_v1 = vmax.f32 %v2866_v27, %v2880_v48  ;;  %v3662_v60 = vmov 0  }
 0x13b   : > { %736 = vmax.xlane.f32.xlu0 %v735_v34  ;;  %v3659_v34 = vmov 0  ;;  %757 = vmax.xlane.f32.xlu1 %v756_v2  ;;  %v591_v17 = vpack.c.b16 %v560_v16, %v559_v14  ;;  %v3663_v16 = vmov 0 }
 0x13c   : > { %v3660_v34 = vsel %vm2860_vm13, 4294967295, %v3659_v34  ;;  %vm607_vm13 = vnez %v588_v57  ;;  %v593_v13 = vpack.c.b16 %v562_v15, %v561_v36  ;;  %v3666_v15 = vmov 0 }
 0x13d   : > { %3661 = vst [vmem:[#allocation17_spill] sm:$0xff] %v3660_v34  ;;  %v590_v34 = vpack.c.b8 %v589_v29, %v589_v29  ;;  %v592_v19 = vpack.c.b8 %v591_v17, %v591_v17  ;;  %v3669_v29 = vmov 0  ;;  %v3672_v36 = vmov 0 }
 0x13e   : > { %v594_v53 = vpack.c.b8 %v593_v13, %v593_v13 }
 0x13f   : > { %742 = vmax.xlane.f32.xlu0 %v741_v63  ;;  %v623_v63 = vsel %vm607_vm13, 16843009, %v3662_v60  ;;  %vm608_vm2 = vnez %v590_v34  ;;  %vm609_vm9 = vnez %v592_v19 }
 0x140   : > { %v651_v35 = vunpack.c.0.s8 %v623_v63  ;;  %v652_v31 = vunpack.c.1.s8 %v623_v63  ;;  %v624_v4 = vsel %vm608_vm2, 16843009, %v3662_v60  ;;  %v625_v14 = vsel %vm609_vm9, 16843009, %v3662_v60 }
 0x141   : > { %v653_v2 = vunpack.c.0.s8 %v624_v4  ;;  %v654_v61 = vunpack.c.1.s8 %v624_v4  ;;  %vm610_vm13 = vnez %v594_v53  ;;  %v656_v63 = vunpack.c.1.s8 %v625_v14 }
 0x142   : > { %vm2886_vm12 = vcmp.ne.s32.totalorder %v651_v35, 0  ;;  %vm2890_vm0 = vcmp.ne.s32.totalorder %v652_v31, 0  ;;  %v3675_v35 = vmov 0  ;;  %v3678_v53 = vmov 0 }
 0x143   : > { %748 = vmax.xlane.f32.xlu0 %v747_v62  ;;  %v3664_v16 = vsel %vm2886_vm12, 4294967295, %v3663_v16  ;;  %v3667_v15 = vsel %vm2890_vm0, 4294967295, %v3666_v15  ;;  %v2897_v62 = vsel %vm2886_vm12, %v504_v30, -1e+30  ;;  %v2901_v13 = vsel %vm2890_vm0, %v506_v33, -1e+30 }
 0x144   : > { %3665 = vst [vmem:[#allocation18_spill] sm:$0xff] %v3664_v16  ;;  %3668 = vst [vmem:[#allocation19_spill] sm:$0xff] %v3667_v15  ;;  %vm2903_vm2 = vcmp.ne.s32.totalorder %v653_v2, 0  ;;  %vm2907_vm4 = vcmp.ne.s32.totalorder %v654_v61, 0  ;;  %v759_v34 = vmax.f32 %v2897_v62, %v2901_v13  ;;  %v514_v30 = vpop.f32.mrb[28].mxu0  ;;  %v655_v33 = vunpack.c.0.s8 %v625_v14 }
 0x145   : > { %v3670_v29 = vsel %vm2903_vm2, 4294967295, %v3669_v29  ;;  %v3673_v36 = vsel %vm2907_vm4, 4294967295, %v3672_v36  ;;  %v2913_v19 = vsel %vm2903_vm2, %v508_v3, -1e+30  ;;  %v2917_v57 = vsel %vm2907_vm4, %v510_v52, -1e+30 }
 0x146   : > { %3671 = vst [vmem:[#allocation20_spill] sm:$0xff] %v3670_v29  ;;  %3674 = vst [vmem:[#allocation21_spill] sm:$0xff] %v3673_v36  ;;  %v762_v61 = vmax.f32 %v2913_v19, %v2917_v57  ;;  %v516_v17 = vpop.f32.mrb[29].mxu0  ;;  %vm2924_vm9 = vcmp.ne.s32.totalorder %v655_v33, 0  ;;  %vm2932_vm0 = vcmp.ne.s32.totalorder %v656_v63, 0  ;;  %v3681_v33 = vmov 0 }
 0x147   : > { %754 = vmax.xlane.f32.xlu0 %v753_v1  ;;  %v626_v1 = vsel %vm610_vm13, 16843009, %v3662_v60  ;;  %v3676_v35 = vsel %vm2924_vm9, 4294967295, %v3675_v35  ;;  %v518_v3 = vpop.f32.mrb[30].mxu0  ;;  %v2930_v4 = vsel %vm2924_vm9, %v514_v30, -1e+30 }
 0x148   : > { %3677 = vst [vmem:[#allocation22_spill] sm:$0xff] %v3676_v35  ;;  %v657_v31 = vunpack.c.0.s8 %v626_v1  ;;  %v658_v52 = vunpack.c.1.s8 %v626_v1  ;;  %763 = vmax.xlane.f32.xlu1 %v762_v61  ;;  %v3679_v53 = vsel %vm2932_vm0, 4294967295, %v3678_v53  ;;  %v520_v2 = vpop.f32.mrb[31].mxu0  ;;  %v2938_v14 = vsel %vm2932_vm0, %v516_v17, -1e+30  ;;  %v2960_v1 = vpop.permute.xlu1 %1613 }
 0x149   : > { %3680 = vst [vmem:[#allocation23_spill] sm:$0xff] %v3679_v53  ;;  %v3684_v61 = vmov 0  ;;  %vm3687_vm0 = vcmask 261120  }
 0x14a   : > { %vm2940_vm13 = vcmp.ne.s32.totalorder %v657_v31, 0  ;;  %vm2944_vm12 = vcmp.ne.s32.totalorder %v658_v52, 0  ;;  %vm3688_vm9 = vmmov %vm3687_vm0 }
 0x14b   : > { %760 = vmax.xlane.f32.xlu0 %v759_v34  ;;  %v3682_v33 = vsel %vm2940_vm13, 4294967295, %v3681_v33  ;;  %v3685_v61 = vsel %vm2944_vm12, 4294967295, %v3684_v61  ;;  %v2950_v30 = vsel %vm2940_vm13, %v518_v3, -1e+30  ;;  %v2954_v63 = vsel %vm2944_vm12, %v520_v2, -1e+30 }
 0x14c   : > { %3683 = vst [vmem:[#allocation24_spill] sm:$0xff] %v3682_v33  ;;  %3686 = vst [vmem:[#allocation25_spill] sm:$0xff] %v3685_v61  ;;  %v765_v34 = vmax.f32 %v2930_v4, %v2938_v14  ;;  %v768_v17 = vmax.f32 %v2950_v30, %v2954_v63  ;;  %v2964_v53 = vpop.permute.xlu1 %1631 }
 0x14e   : > { %769 = vmax.xlane.f32.xlu1 %v768_v17 }
 0x14f   : > { %766 = vmax.xlane.f32.xlu0 %v765_v34 }
 0x150   : > { %v2968_v33 = vpop.permute.xlu1 %1615 }
 0x17b   : > { %v725_v31 = vpop.xlane.xlu0 %724 }
 0x17c   : > { %v771_v52 = vsub.f32 %v2625_v47, %v725_v31  ;;  %v772_v3 = vsub.f32 %v2637_v51, %v725_v31  ;;  %v2970_v47 = vpop.permute.xlu1 %1617 }
 0x17e   : > { %v803_v35 = vmul.f32 1.442695, %v771_v52  ;;  %v805_v2 = vmul.f32 1.442695, %v772_v3 }
 0x17f   : > { %v728_v15 = vpop.xlane.xlu0 %727 }
 0x180   : > { %2232 = vpow2.f32 %v803_v35  ;;  %v773_v16 = vsub.f32 %v2643_v55, %v728_v15  ;;  %v774_v61 = vsub.f32 %v2647_v56, %v728_v15  ;;  %v2974_v29 = vpop.permute.xlu1 %1619 }
 0x181   : > { %2234 = vpow2.f32 %v805_v2 }
 0x182   : > { %v807_v34 = vmul.f32 1.442695, %v773_v16  ;;  %v809_v17 = vmul.f32 1.442695, %v774_v61  ;;  %v2226_v16 = vld [vmem:[%s3546_s1 + $0x20] ss:$8 sps:$4 sm:$0xff]  }
 0x183   : > { %v1630_v36 = vpop.permute.xlu0 %1629  ;;  %v2229_v61 = vld [vmem:[%s3546_s1 + $0x30] ss:$8 sps:$4 sm:$0xff]  }
 0x184   : > { %2236 = vpow2.f32 %v807_v34  ;;  %2105 = vmatprep.subr.bf16.mxu1 %v1630_v36  ;;  %v2231_v36 = vld [vmem:[%s3546_s1 + $0x34] ss:$8 sps:$4 sm:$0xff]   ;;  %v2988_v2 = vpop.permute.xlu1 %1621 }
 0x185   : > { %2238 = vpow2.f32 %v809_v17 }
 0x188   : > { %v2992_v34 = vpop.permute.xlu1 %1623 }
 0x18a   : > { %v2233_v51 = vpop.eup %2232 }
 0x18b   : > { %v2235_v31 = vpop.eup %2234 }
 0x18c   : > { %v2972_v52 = vadd.f32 %v2235_v31, %v2233_v51  ;;  %v2995_v17 = vpop.permute.xlu1 %1625 }
 0x18e   : > { %v2237_v35 = vpop.eup %2236 }
 0x18f   : > { %v2239_v3 = vpop.eup %2238  ;;  %v963_v55 = vpack.c.bf16 %v2237_v35, %v2233_v51 }
 0x190   : > { %v964_v56 = vpack.c.bf16 %v2239_v3, %v2235_v31  ;;  %v2979_v15 = vadd.f32 %v2239_v3, %v2237_v35  ;;  %v1634_v3 = vpop.permute.xlu0 %1633 }
 0x192   : > { %1107 = vmatprep.mubr.bf16.mxu0 %v964_v56 }
 0x193   : > { %1108 = vmatmul.mubr.bf16.vlgmr.msra.gmra.mrb[32].mxu0 %v963_v55 }
 0x194   : > { %1213 = vmatpush1.bf16.msra.mxu0 %v2226_v16  ;;  %1244 = vmatprep.mubr.bf16.mxu0 %v3662_v60 }
 0x195   : > { %1214 = vmatprep.subr.bf16.mxu0 %v2231_v36 }
 0x198   : > { %1215 = vmatpush1.bf16.msra.mxu0 %v2229_v61 }
 0x19b   : > { %2029 = vmatmul.mubr.msk.bf16.vlgmr.msra.gmra.mrb[36].mxu0 %vm3687_vm0, %v2496_v5 }
 0x19c   : > { %1254 = vmatprep.mubr.bf16.mxu0 %v3662_v60 }
 0x1a3   : > { %2030 = vmatmul.mubr.msk.bf16.gmra.mrb[40].mxu0 %vm3688_vm9, %v2501_v6  ;;  %vm3689_vm9 = vmmov %vm3687_vm0 }
 0x1a4   : > { %1264 = vmatprep.mubr.bf16.mxu0 %v3662_v60  ;;  %v731_v51 = vpop.xlane.xlu1 %730 }
 0x1a5   : > { %v775_v31 = vsub.f32 %v2684_v21, %v731_v51  ;;  %v776_v35 = vsub.f32 %v2688_v26, %v731_v51  ;;  %v1636_v21 = vpop.permute.xlu0 %1635 }
 0x1a7   : > { %v811_v55 = vmul.f32 1.442695, %v775_v31  ;;  %v813_v5 = vmul.f32 1.442695, %v776_v35 }
 0x1a8   : > { %v734_v56 = vpop.xlane.xlu1 %733 }
 0x1a9   : > { %v777_v16 = vsub.f32 %v2707_v40, %v734_v56  ;;  %v778_v6 = vsub.f32 %v2711_v41, %v734_v56  ;;  %2240 = vpow2.f32 %v811_v55 }
 0x1aa   : > { %2242 = vpow2.f32 %v813_v5 }
 0x1ab   : > { %2031 = vmatmul.mubr.msk.bf16.gmra.mrb[44].mxu0 %vm3687_vm0, %v2506_v7  ;;  %v815_v36 = vmul.f32 1.442695, %v777_v16  ;;  %v817_v61 = vmul.f32 1.442695, %v778_v6  ;;  %v1638_v7 = vpop.permute.xlu0 %1637 }
 0x1ac   : > { %1274 = vmatprep.mubr.bf16.mxu0 %v3662_v60  ;;  %v740_v26 = vpop.xlane.xlu1 %739 }
 0x1ad   : > { %2244 = vpow2.f32 %v815_v36  ;;  %v781_v51 = vsub.f32 %v2732_v18, %v740_v26  ;;  %v782_v40 = vsub.f32 %v2736_v22, %v740_v26 }
 0x1ae   : > { %2246 = vpow2.f32 %v817_v61 }
 0x1af   : > { %v823_v35 = vmul.f32 1.442695, %v781_v51  ;;  %v825_v56 = vmul.f32 1.442695, %v782_v40 }
 0x1b1   : > { %2248 = vpow2.f32 %v823_v35 }
 0x1b2   : > { %2250 = vpow2.f32 %v825_v56 }
 0x1b3   : > { %2032 = vmatmul.mubr.msk.bf16.gmra.mrb[48].mxu0 %vm3689_vm9, %v2511_v8  ;;  %v2241_v31 = vpop.eup %2240  ;;  %v1640_v8 = vpop.permute.xlu0 %1639  ;;  %vm3690_vm9 = vmmov %vm3687_vm0 }
 0x1b4   : > { %1284 = vmatprep.mubr.bf16.mxu0 %v3662_v60  ;;  %v2243_v41 = vpop.eup %2242 }
 0x1b5   : > { %v3021_v26 = vadd.f32 %v2243_v41, %v2241_v31 }
 0x1b7   : > { %v2245_v55 = vpop.eup %2244  ;;  %v746_v36 = vpop.xlane.xlu1 %745 }
 0x1b8   : > { %v2247_v5 = vpop.eup %2246  ;;  %v965_v16 = vpack.c.bf16 %v2245_v55, %v2241_v31  ;;  %v785_v18 = vsub.f32 %v2760_v58, %v746_v36  ;;  %v786_v22 = vsub.f32 %v2764_v0, %v746_v36  ;;  %v1642_v51 = vpop.permute.xlu0 %1641 }
 0x1b9   : > { %v966_v6 = vpack.c.bf16 %v2247_v5, %v2243_v41 }
 0x1ba   : > { %v831_v61 = vmul.f32 1.442695, %v785_v18  ;;  %v833_v40 = vmul.f32 1.442695, %v786_v22 }
 0x1bb   : > { %2033 = vmatmul.mubr.msk.bf16.gmra.mrb[52].mxu0 %vm3687_vm0, %v2516_v9  ;;  %1115 = vmatprep.mubr.bf16.mxu1 %v966_v6  ;;  %v3019_v9 = vadd.f32 %v2247_v5, %v2245_v55  ;;  %v3027_v58 = vpop.eup %2248 }
 0x1bc   : > { %1294 = vmatprep.mubr.bf16.mxu0 %v3662_v60  ;;  %1116 = vmatmul.mubr.bf16.vlgmr.msra.gmra.mrb[0].mxu1 %v965_v16  ;;  %2252 = vpow2.f32 %v831_v61 }
 0x1bd   : > { %2106 = vmatpush3.bf16.msra.mxu1 %v2960_v1  ;;  %2254 = vpow2.f32 %v833_v40 }
 0x1be   : > { %2107 = vmatprep.subr.bf16.mxu1 %v2964_v53  ;;  %v3029_v53 = vpop.eup %2250 }
 0x1c1   : > { %2108 = vmatpush3.bf16.msra.mxu1 %v2968_v33  ;;  %v752_v0 = vpop.xlane.xlu1 %751  ;;  %v3038_v33 = vadd.f32 %v3029_v53, %v3027_v58 }
 0x1c2   : > { %2109 = vmatprep.subr.bf16.mxu1 %v1634_v3  ;;  %v789_v31 = vsub.f32 %v2830_v54, %v752_v0  ;;  %v790_v41 = vsub.f32 %v2834_v59, %v752_v0 }
 0x1c3   : > { %2034 = vmatmul.mubr.msk.bf16.gmra.mrb[56].mxu0 %vm3690_vm9, %v2521_v10  ;;  %vm3691_vm9 = vmmov %vm3687_vm0 }
 0x1c4   : > { %1304 = vmatprep.mubr.bf16.mxu0 %v3662_v60  ;;  %v839_v56 = vmul.f32 1.442695, %v789_v31  ;;  %v841_v59 = vmul.f32 1.442695, %v790_v41 }
 0x1c5   : > { %2110 = vmatpush3.bf16.msra.mxu1 %v2970_v47 }
 0x1c6   : > { %2111 = vmatprep.subr.bf16.mxu1 %v1636_v21  ;;  %v3048_v5 = vpop.eup %2252 }
 0x1c7   : > { %v3050_v6 = vpop.eup %2254 }
 0x1c8   : > { %v737_v1 = vpop.xlane.xlu0 %736  ;;  %v758_v47 = vpop.xlane.xlu1 %757 }
 0x1c9   : > { %v779_v10 = vsub.f32 %v2779_v28, %v737_v1  ;;  %v780_v35 = vsub.f32 %v2788_v39, %v737_v1  ;;  %2112 = vmatpush3.bf16.msra.mxu1 %v2974_v29  ;;  %v793_v21 = vsub.f32 %v2870_v20, %v758_v47 }
 0x1ca   : > { %2113 = vmatprep.subr.bf16.mxu1 %v1638_v7 }
 0x1cb   : > { %2035 = vmatmul.mubr.msk.bf16.gmra.mrb[60].mxu0 %vm3687_vm0, %v2526_v11  ;;  %v819_v3 = vmul.f32 1.442695, %v779_v10  ;;  %v821_v55 = vmul.f32 1.442695, %v780_v35  ;;  %v794_v11 = vsub.f32 %v2874_v32, %v758_v47  ;;  %v847_v36 = vmul.f32 1.442695, %v793_v21 }
 0x1cc   : > { %1314 = vmatprep.mubr.bf16.mxu0 %v3662_v60  ;;  %v743_v54 = vpop.xlane.xlu0 %742  ;;  %v3057_v32 = vadd.f32 %v3050_v6, %v3048_v5 }
 0x1cd   : > { %2256 = vpow2.f32 %v819_v3  ;;  %v783_v28 = vsub.f32 %v2792_v42, %v743_v54  ;;  %v784_v39 = vsub.f32 %v2796_v46, %v743_v54  ;;  %v849_v42 = vmul.f32 1.442695, %v794_v11  ;;  %2114 = vmatpush3.bf16.msra.mxu1 %v2988_v2 }
 0x1ce   : > { %2258 = vpow2.f32 %v821_v55  ;;  %2115 = vmatprep.subr.bf16.mxu1 %v1640_v8 }
 0x1cf   : > { %v827_v16 = vmul.f32 1.442695, %v783_v28  ;;  %v829_v60 = vmul.f32 1.442695, %v784_v39  ;;  %2260 = vpow2.f32 %v839_v56 }
 0x1d0   : > { %v749_v29 = vpop.xlane.xlu0 %748  ;;  %2262 = vpow2.f32 %v841_v59 }
 0x1d1   : > { %2264 = vpow2.f32 %v827_v16  ;;  %v787_v46 = vsub.f32 %v2812_v38, %v749_v29  ;;  %v788_v20 = vsub.f32 %v2816_v43, %v749_v29  ;;  %2116 = vmatpush3.bf16.msra.mxu1 %v2992_v34 }
 0x1d2   : > { %2266 = vpow2.f32 %v829_v60  ;;  %2117 = vmatprep.subr.bf16.mxu1 %v1642_v51 }
 0x1d3   : > { %2036 = vmatmul.mubr.msk.bf16.gmra.mrb[64].mxu0 %vm3691_vm9, %v2531_v12  ;;  %v835_v7 = vmul.f32 1.442695, %v787_v46  ;;  %v837_v18 = vmul.f32 1.442695, %v788_v20  ;;  %2268 = vpow2.f32 %v847_v36 }
 0x1d4   : > { %v755_v22 = vpop.xlane.xlu0 %754  ;;  %2270 = vpow2.f32 %v849_v42 }
 0x1d5   : > { %2272 = vpow2.f32 %v835_v7  ;;  %v791_v38 = vsub.f32 %v2866_v27, %v755_v22  ;;  %v792_v43 = vsub.f32 %v2880_v48, %v755_v22  ;;  %v764_v40 = vpop.xlane.xlu1 %763  ;;  %2118 = vmatpush3.bf16.msra.mxu1 %v2995_v17 }
 0x1d6   : > { %2274 = vpow2.f32 %v837_v18  ;;  %v797_v31 = vsub.f32 %v2913_v19, %v764_v40  ;;  %v798_v41 = vsub.f32 %v2917_v57, %v764_v40 }
 0x1d7   : > { %v2257_v2 = vpop.eup %2256  ;;  %v843_v8 = vmul.f32 1.442695, %v791_v38  ;;  %v845_v61 = vmul.f32 1.442695, %v792_v43 }
 0x1d8   : > { %v2259_v0 = vpop.eup %2258  ;;  %v967_v12 = vpack.c.bf16 %v3027_v58, %v2257_v2  ;;  %v761_v1 = vpop.xlane.xlu0 %760  ;;  %v855_v35 = vmul.f32 1.442695, %v797_v31  ;;  %v857_v57 = vmul.f32 1.442695, %v798_v41 }
 0x1d9   : > { %v2261_v34 = vpop.eup %2260  ;;  %v968_v27 = vpack.c.bf16 %v3029_v53, %v2259_v0  ;;  %2276 = vpow2.f32 %v843_v8  ;;  %v795_v48 = vsub.f32 %v2897_v62, %v761_v1  ;;  %v796_v51 = vsub.f32 %v2901_v13, %v761_v1 }
 0x1da   : > { %v2263_v10 = vpop.eup %2262  ;;  %2278 = vpow2.f32 %v845_v61  ;;  %v3071_v3 = vadd.f32 %v2259_v0, %v2257_v2 }
 0x1db   : > { %v2265_v58 = vpop.eup %2264  ;;  %1123 = vmatprep.mubr.bf16.mxu1 %v968_v27  ;;  %v851_v19 = vmul.f32 1.442695, %v795_v48  ;;  %v853_v55 = vmul.f32 1.442695, %v796_v51  ;;  %v3073_v56 = vadd.f32 %v2263_v10, %v2261_v34  ;;  %2280 = vpow2.f32 %v855_v35  ;;  %v770_v54 = vpop.xlane.xlu1 %769 }
 0x1dc   : > { %v2267_v17 = vpop.eup %2266  ;;  %1124 = vmatmul.mubr.bf16.gmra.mrb[4].mxu1 %v967_v12  ;;  %v767_v53 = vpop.xlane.xlu0 %766  ;;  %v801_v47 = vsub.f32 %v2950_v30, %v770_v54  ;;  %v802_v21 = vsub.f32 %v2954_v63, %v770_v54 }
 0x1dd   : > { %v2269_v62 = vpop.eup %2268  ;;  %v970_v13 = vpack.c.bf16 %v3050_v6, %v2267_v17  ;;  %2282 = vpow2.f32 %v851_v19  ;;  %v799_v59 = vsub.f32 %v2930_v4, %v767_v53  ;;  %v800_v28 = vsub.f32 %v2938_v14, %v767_v53 }
 0x1de   : > { %v2271_v39 = vpop.eup %2270  ;;  %2284 = vpow2.f32 %v853_v55  ;;  %v3080_v11 = vadd.f32 %v2267_v17, %v2265_v58  ;;  %v969_v6 = vpack.c.bf16 %v3048_v5, %v2265_v58  ;;  %v863_v4 = vmul.f32 1.442695, %v801_v47 }
 0x1df   : > { %v2273_v16 = vpop.eup %2272  ;;  %1131 = vmatprep.mubr.bf16.mxu1 %v970_v13  ;;  %2286 = vpow2.f32 %v857_v57  ;;  %v859_v60 = vmul.f32 1.442695, %v799_v59  ;;  %v861_v36 = vmul.f32 1.442695, %v800_v28  ;;  %v3085_v14 = vadd.f32 %v2271_v39, %v2269_v62 }
 0x1e0   : > { %v2275_v29 = vpop.eup %2274  ;;  %v865_v20 = vmul.f32 1.442695, %v802_v21  ;;  %v971_v38 = vpack.c.bf16 %v2261_v34, %v2273_v16 }
 0x1e1   : > { %v972_v42 = vpack.c.bf16 %v2263_v10, %v2275_v29  ;;  %v3083_v46 = vadd.f32 %v2275_v29, %v2273_v16  ;;  %2288 = vpow2.f32 %v859_v60 }
 0x1e2   : > { %2290 = vpow2.f32 %v861_v36 }
 0x1e3   : > { %v2277_v30 = vpop.eup %2276  ;;  %2292 = vpow2.f32 %v863_v4 }
 0x1e4   : > { %v2279_v63 = vpop.eup %2278  ;;  %1132 = vmatmul.mubr.bf16.gmra.mrb[8].mxu1 %v969_v6  ;;  %2294 = vpow2.f32 %v865_v20  ;;  %v973_v31 = vpack.c.bf16 %v2269_v62, %v2277_v30 }
 0x1e5   : > { %1139 = vmatprep.mubr.bf16.mxu1 %v972_v42  ;;  %v3087_v7 = vadd.f32 %v2279_v63, %v2277_v30  ;;  %v2281_v18 = vpop.eup %2280  ;;  %v974_v2 = vpack.c.bf16 %v2271_v39, %v2279_v63 }
 0x1e7   : > { %v2283_v5 = vpop.eup %2282 }
 0x1e8   : > { %v2285_v22 = vpop.eup %2284  ;;  %v975_v34 = vpack.c.bf16 %v2281_v18, %v2283_v5 }
 0x1e9   : > { %v2287_v43 = vpop.eup %2286  ;;  %v3089_v8 = vadd.f32 %v2285_v22, %v2283_v5  ;;  %v3696_v5 = vld [vmem:[#allocation2_spill] sm:$0xff] }
 0x1ea   : > { %v3091_v61 = vadd.f32 %v2287_v43, %v2281_v18  ;;  %v976_v41 = vpack.c.bf16 %v2287_v43, %v2285_v22  ;;  %v3698_v43 = vld [vmem:[#allocation3_spill] sm:$0xff] }
 0x1eb   : > { %v2289_v40 = vpop.eup %2288 }
 0x1ec   : > { %1140 = vmatmul.mubr.bf16.gmra.mrb[12].mxu1 %v971_v38  ;;  %v2291_v0 = vpop.eup %2290 }
 0x1ed   : > { %1147 = vmatprep.mubr.bf16.mxu1 %v974_v2  ;;  %v2293_v12 = vpop.eup %2292  ;;  %v3093_v27 = vadd.f32 %v2291_v0, %v2289_v40 }
 0x1ee   : > { %v2295_v1 = vpop.eup %2294  ;;  %v977_v10 = vpack.c.bf16 %v2293_v12, %v2289_v40 }
 0x1ef   : > { %v3095_v48 = vadd.f32 %v2295_v1, %v2293_v12  ;;  %v978_v51 = vpack.c.bf16 %v2295_v1, %v2291_v0  ;;  %v3700_v12 = vld [vmem:[#allocation8_spill] sm:$0xff] }
 0x1f4   : > { %1148 = vmatmul.mubr.bf16.gmra.mrb[16].mxu1 %v973_v31 }
 0x1f5   : > { %1155 = vmatprep.mubr.bf16.mxu1 %v976_v41  ;;  %v3702_v41 = vld [vmem:[#allocation9_spill] sm:$0xff] }
 0x1fc   : > { %1156 = vmatmul.mubr.bf16.gmra.mrb[20].mxu1 %v975_v34 }
 0x1fd   : > { %1163 = vmatprep.mubr.bf16.mxu1 %v978_v51 }
 0x204   : > { %1164 = vmatmul.mubr.bf16.gmra.mrb[24].mxu1 %v977_v10  ;;  %v3704_v10 = vld [vmem:[#allocation5_spill] sm:$0xff] }
 0x266   : > { %v2057_v35 = vpop.f32.mrb[32].mxu0 }
 0x267   : > { %v2058_v58 = vpop.f32.mrb[33].mxu0 }
 0x268   : > { %v3097_v19 = vadd.f32 %v2058_v58, %v2057_v35  ;;  %v2060_v55 = vpop.f32.mrb[34].mxu0 }
 0x269   : > { %v2061_v57 = vpop.f32.mrb[35].mxu0 }
 0x26a   : > { %3692 = vst [vmem:[#allocation26_spill] sm:$0xff] %v3097_v19  ;;  %v3099_v17 = vadd.f32 %v2061_v57, %v2060_v55  ;;  %v3706_v57 = vld [vmem:[#allocation6_spill] sm:$0xff] }
 0x26c   : > { %3693 = vst [vmem:[#allocation27_spill] sm:$0xff] %v3099_v17 }
 0x26e   : > { %v1246_v53 = vpop.f32.mrb[36].mxu0 }
 0x26f   : > { %v3103_v54 = vsel %vm2615_vm5, %v1246_v53, -1e+30  ;;  %v1248_v62 = vpop.f32.mrb[37].mxu0  ;;  %vm3697_vm5 = vnez %v3696_v5 }
 0x270   : > { %v3107_v13 = vsel %vm2619_vm6, %v1248_v62, -1e+30  ;;  %v1250_v59 = vpop.f32.mrb[38].mxu0  ;;  %vm3699_vm6 = vnez %v3698_v43  ;;  %v2425_v43 = vld [vmem:[%s3547_s2 + $0x78] sm:$0xff]  }
 0x271   : > { %v3111_v28 = vsel %vm2627_vm7, %v1250_v59, -1e+30  ;;  %v1252_v39 = vpop.f32.mrb[39].mxu0  ;;  %v1357_v47 = vmax.f32 %v3103_v54, %v3107_v13  ;;  %vm3701_vm7 = vnez %v3700_v12 }
 0x272   : > { %v3117_v21 = vsel %vm2631_vm8, %v1252_v39, -1e+30  ;;  %vm3703_vm8 = vnez %v3702_v41 }
 0x273   : > { %1358 = vmax.xlane.f32.xlu0 %v1357_v47  ;;  %v1360_v44 = vmax.f32 %v3111_v28, %v3117_v21 }
 0x275   : > { %1361 = vmax.xlane.f32.xlu1 %v1360_v44 }
 0x276   : > { %v1256_v45 = vpop.f32.mrb[40].mxu0 }
 0x277   : > { %v3123_v16 = vsel %vm2674_vm10, %v1256_v45, -1e+30  ;;  %v1258_v49 = vpop.f32.mrb[41].mxu0  ;;  %vm3705_vm10 = vnez %v3704_v10 }
 0x278   : > { %v3127_v60 = vsel %vm2678_vm11, %v1258_v49, -1e+30  ;;  %v1260_v29 = vpop.f32.mrb[42].mxu0  ;;  %vm3707_vm11 = vnez %v3706_v57 }
 0x279   : > { %v3131_v50 = vsel %vm2697_vm15, %v1260_v29, -1e+30  ;;  %v1262_v6 = vpop.f32.mrb[43].mxu0  ;;  %v1363_v36 = vmax.f32 %v3123_v16, %v3127_v60 }
 0x27a   : > { %v3137_v42 = vsel %vm2701_vm1, %v1262_v6, -1e+30 }
 0x27b   : > { %1364 = vmax.xlane.f32.xlu0 %v1363_v36  ;;  %v1366_v23 = vmax.f32 %v3131_v50, %v3137_v42 }
 0x27d   : > { %1367 = vmax.xlane.f32.xlu1 %v1366_v23 }
 0x27e   : > { %v1266_v24 = vpop.f32.mrb[44].mxu0 }
 0x27f   : > { %v3143_v20 = vsel %vm2746_vm3, %v1266_v24, -1e+30  ;;  %v1268_v37 = vpop.f32.mrb[45].mxu0 }
 0x280   : > { %v3147_v63 = vsel %vm2766_vm14, %v1268_v37, -1e+30  ;;  %v1270_v18 = vpop.f32.mrb[46].mxu0 }
 0x281   : > { %v3151_v25 = vsel %vm3697_vm5, %v1270_v18, -1e+30  ;;  %v1272_v22 = vpop.f32.mrb[47].mxu0  ;;  %v1369_v38 = vmax.f32 %v3143_v20, %v3147_v63  ;;  %v2424_v18 = vld [vmem:[%s3547_s2 + $0x38] sm:$0xff]  }
 0x282   : > { %v3157_v2 = vsel %vm3699_vm6, %v1272_v22, -1e+30 }
 0x283   : > { %1370 = vmax.xlane.f32.xlu0 %v1369_v38  ;;  %v1372_v40 = vmax.f32 %v3151_v25, %v3157_v2 }
 0x285   : > { %1373 = vmax.xlane.f32.xlu1 %v1372_v40 }
 0x286   : > { %v1276_v0 = vpop.f32.mrb[48].mxu0 }
 0x287   : > { %v3163_v1 = vsel %vm3701_vm7, %v1276_v0, -1e+30  ;;  %v1278_v31 = vpop.f32.mrb[49].mxu0 }
 0x288   : > { %v3167_v34 = vsel %vm3703_vm8, %v1278_v31, -1e+30  ;;  %v1280_v51 = vpop.f32.mrb[50].mxu0 }
 0x289   : > { %v3171_v35 = vsel %vm3705_vm10, %v1280_v51, -1e+30  ;;  %v1282_v58 = vpop.f32.mrb[51].mxu0  ;;  %v1375_v55 = vmax.f32 %v3163_v1, %v3167_v34 }
 0x28a   : > { %v3177_v53 = vsel %vm3707_vm11, %v1282_v58, -1e+30 }
 0x28b   : > { %1376 = vmax.xlane.f32.xlu0 %v1375_v55  ;;  %v1378_v62 = vmax.f32 %v3171_v35, %v3177_v53 }
 0x28d   : > { %1379 = vmax.xlane.f32.xlu1 %v1378_v62 }
 0x28e   : > { %v1286_v59 = vpop.f32.mrb[52].mxu0 }
 0x28f   : > { %v1288_v39 = vpop.f32.mrb[53].mxu0  ;;  %v2063_v45 = vpop.f32.mrb[0].mxu1 }
 0x290   : > { %v1290_v47 = vpop.f32.mrb[54].mxu0  ;;  %v2064_v49 = vpop.f32.mrb[1].mxu1 }
 0x291   : > { %v1292_v44 = vpop.f32.mrb[55].mxu0  ;;  %v2066_v29 = vpop.f32.mrb[2].mxu1  ;;  %v3181_v23 = vadd.f32 %v2064_v49, %v2063_v45 }
 0x292   : > { %v2067_v6 = vpop.f32.mrb[3].mxu1 }
 0x293   : > { %3708 = vst [vmem:[#allocation4_spill] sm:$0xff] %v3181_v23  ;;  %v3183_v24 = vadd.f32 %v2067_v6, %v2066_v29  ;;  %v3715_v23 = vld [vmem:[#allocation11_spill] sm:$0xff] }
 0x294   : > { %vm3716_vm1 = vnez %v3715_v23 }
 0x295   : > { %3709 = vst [vmem:[#allocation7_spill] sm:$0xff] %v3183_v24  ;;  %v3205_v17 = vsel %vm3716_vm1, %v1288_v39, -1e+30 }
 0x296   : > { %v1296_v36 = vpop.f32.mrb[56].mxu0 }
 0x297   : > { %v1298_v4 = vpop.f32.mrb[57].mxu0 }
 0x298   : > { %v1300_v37 = vpop.f32.mrb[58].mxu0 }
 0x299   : > { %v1302_v30 = vpop.f32.mrb[59].mxu0 }
 0x29e   : > { %1627 = vrot.lane.b32.xlu1 %v2424_v18, %s2435_s12  ;;  %v1306_v5 = vpop.f32.mrb[60].mxu0 }
 0x29f   : > { %v1308_v22 = vpop.f32.mrb[61].mxu0 }
 0x2a0   : > { %v1310_v38 = vpop.f32.mrb[62].mxu0 }
 0x2a1   : > { %1643 = vrot.lane.b32.xlu0 %v2425_v43, %s2435_s12  ;;  %v1312_v40 = vpop.f32.mrb[63].mxu0  ;;  %v3713_v43 = vld [vmem:[#allocation10_spill] sm:$0xff]  ;;  %s2436_s12 = smov 16  }
 0x2a2   : > { %vm3714_vm15 = vnez %v3713_v43 }
 0x2a3   : > { %v3201_v24 = vsel %vm3714_vm15, %v1286_v59, -1e+30  ;;  %v3724_v59 = vld [vmem:[#allocation15_spill] sm:$0xff] }
 0x2a4   : > { %vm3725_vm9 = vnez %v3724_v59  ;;  %v1381_v39 = vmax.f32 %v3201_v24, %v3205_v17  ;;  %v3729_v59 = vld [vmem:[#allocation16_spill] sm:$0xff] }
 0x2a5   : > { %v3223_v43 = vsel %vm3725_vm9, %v1298_v4, -1e+30  ;;  %vm3730_vm5 = vnez %v3729_v59 }
 0x2a6   : > { %v1316_v0 = vpop.f32.mrb[64].mxu0 }
 0x2a7   : > { %v1318_v12 = vpop.f32.mrb[65].mxu0 }
 0x2a8   : > { %v1320_v31 = vpop.f32.mrb[66].mxu0 }
 0x2a9   : > { %v1322_v41 = vpop.f32.mrb[67].mxu0 }
 0x2af   : > { %v2069_v51 = vpop.f32.mrb[4].mxu1 }
 0x2b0   : > { %v2070_v10 = vpop.f32.mrb[5].mxu1 }
 0x2b1   : > { %v3193_v58 = vadd.f32 %v2070_v10, %v2069_v51  ;;  %v2072_v55 = vpop.f32.mrb[6].mxu1  ;;  %v3718_v10 = vld [vmem:[#allocation12_spill] sm:$0xff] }
 0x2b2   : > { %v2073_v57 = vpop.f32.mrb[7].mxu1  ;;  %vm3719_vm3 = vnez %v3718_v10 }
 0x2b3   : > { %3710 = vst [vmem:[#allocation2_spill] sm:$0xff] %v3193_v58  ;;  %v3195_v62 = vadd.f32 %v2073_v57, %v2072_v55  ;;  %v3211_v55 = vsel %vm3719_vm3, %v1290_v47, -1e+30  ;;  %v3720_v57 = vld [vmem:[#allocation13_spill] sm:$0xff]  ;;  %v3738_v58 = vld [vmem:[#allocation19_spill] sm:$0xff] }
 0x2b4   : > { %vm3721_vm14 = vnez %v3720_v57  ;;  %vm3739_vm6 = vnez %v3738_v58  ;;  %v3742_v58 = vld [vmem:[#allocation23_spill] sm:$0xff] }
 0x2b5   : > { %3711 = vst [vmem:[#allocation3_spill] sm:$0xff] %v3195_v62  ;;  %v3253_v62 = vsel %vm2940_vm13, %v1320_v31, -1e+30  ;;  %vm3743_vm13 = vnez %v3742_v58 }
 0x2b7   : > { %v2075_v45 = vpop.f32.mrb[8].mxu1 }
 0x2b8   : > { %v2076_v49 = vpop.f32.mrb[9].mxu1 }
 0x2b9   : > { %v3197_v29 = vadd.f32 %v2076_v49, %v2075_v45  ;;  %v2078_v6 = vpop.f32.mrb[10].mxu1  ;;  %v3215_v45 = vsel %vm3721_vm14, %v1292_v44, -1e+30  ;;  %v3722_v49 = vld [vmem:[#allocation14_spill] sm:$0xff] }
 0x2ba   : > { %v2079_v18 = vpop.f32.mrb[11].mxu1  ;;  %vm3723_vm0 = vnez %v3722_v49 }
 0x2bb   : > { %3712 = vst [vmem:[#allocation8_spill] sm:$0xff] %v3197_v29  ;;  %v3207_v51 = vadd.f32 %v2079_v18, %v2078_v6  ;;  %v3219_v29 = vsel %vm3723_vm0, %v1296_v36, -1e+30  ;;  %v3229_v6 = vsel %vm2903_vm2, %v1310_v38, -1e+30  ;;  %v1384_v36 = vmax.f32 %v3211_v55, %v3215_v45 }
 0x2bc   : > { %v3233_v18 = vsel %vm2907_vm4, %v1312_v40, -1e+30  ;;  %v1387_v4 = vmax.f32 %v3219_v29, %v3223_v43  ;;  %v3243_v38 = vsel %vm3730_vm5, %v1300_v37, -1e+30  ;;  %v3736_v37 = vld [vmem:[#allocation18_spill] sm:$0xff] }
 0x2bd   : > { %3717 = vst [vmem:[#allocation9_spill] sm:$0xff] %v3207_v51  ;;  %v1396_v40 = vmax.f32 %v3229_v6, %v3233_v18  ;;  %vm3737_vm2 = vnez %v3736_v37 }
 0x2bf   : > { %v2081_v44 = vpop.f32.mrb[12].mxu1 }
 0x2c0   : > { %1382 = vmax.xlane.f32.xlu0 %v1381_v39  ;;  %v2082_v10 = vpop.f32.mrb[13].mxu1  ;;  %v3731_v39 = vld [vmem:[#allocation17_spill] sm:$0xff] }
 0x2c1   : > { %v3239_v57 = vadd.f32 %v2082_v10, %v2081_v44  ;;  %v2084_v49 = vpop.f32.mrb[14].mxu1  ;;  %vm3732_vm4 = vnez %v3731_v39  ;;  %v3257_v10 = vsel %vm2944_vm12, %v1322_v41, -1e+30  ;;  %v3267_v39 = vsel %vm3739_vm6, %v1308_v22, -1e+30 }
 0x2c2   : > { %1385 = vmax.xlane.f32.xlu1 %v1384_v36  ;;  %v2085_v23 = vpop.f32.mrb[15].mxu1  ;;  %v3249_v47 = vsel %vm3732_vm4, %v1302_v30, -1e+30  ;;  %v3263_v36 = vsel %vm3737_vm2, %v1306_v5, -1e+30  ;;  %v1402_v31 = vmax.f32 %v3253_v62, %v3257_v10 }
 0x2c3   : > { %3728 = vst [vmem:[#allocation5_spill] sm:$0xff] %v3239_v57  ;;  %v3259_v59 = vadd.f32 %v2085_v23, %v2084_v49  ;;  %v1390_v30 = vmax.f32 %v3243_v38, %v3249_v47  ;;  %v1393_v51 = vmax.f32 %v3263_v36, %v3267_v39  ;;  %v3740_v49 = vld [vmem:[#allocation22_spill] sm:$0xff]  ;;  %v3281_v22 = vsel %vm3743_vm13, %v1318_v12, -1e+30 }
 0x2c4   : > { %1388 = vmax.xlane.f32.xlu0 %v1387_v4  ;;  %vm3741_vm12 = vnez %v3740_v49 }
 0x2c5   : > { %3735 = vst [vmem:[#allocation6_spill] sm:$0xff] %v3259_v59  ;;  %v3277_v5 = vsel %vm3741_vm12, %v1316_v0, -1e+30 }
 0x2c6   : > { %1397 = vmax.xlane.f32.xlu1 %v1396_v40 }
 0x2c7   : > { %v2087_v41 = vpop.f32.mrb[16].mxu1 }
 0x2c8   : > { %1391 = vmax.xlane.f32.xlu0 %v1390_v30  ;;  %v2088_v4 = vpop.f32.mrb[17].mxu1  ;;  %v1399_v30 = vmax.f32 %v3277_v5, %v3281_v22 }
 0x2c9   : > { %v3283_v40 = vadd.f32 %v2088_v4, %v2087_v41  ;;  %v2090_v23 = vpop.f32.mrb[18].mxu1 }
 0x2ca   : > { %1403 = vmax.xlane.f32.xlu1 %v1402_v31  ;;  %v2091_v44 = vpop.f32.mrb[19].mxu1 }
 0x2cb   : > { %3744 = vst [vmem:[#allocation10_spill] sm:$0xff] %v3283_v40  ;;  %v3285_v37 = vadd.f32 %v2091_v44, %v2090_v23 }
 0x2cc   : > { %1394 = vmax.xlane.f32.xlu0 %v1393_v51 }
 0x2cd   : > { %3745 = vst [vmem:[#allocation11_spill] sm:$0xff] %v3285_v37 }
 0x2cf   : > { %v2093_v19 = vpop.f32.mrb[20].mxu1 }
 0x2d0   : > { %1400 = vmax.xlane.f32.xlu0 %v1399_v30  ;;  %v2094_v49 = vpop.f32.mrb[21].mxu1 }
 0x2d1   : > { %v3289_v0 = vadd.f32 %v2094_v49, %v2093_v19  ;;  %v2096_v59 = vpop.f32.mrb[22].mxu1 }
 0x2d2   : > { %v2097_v58 = vpop.f32.mrb[23].mxu1 }
 0x2d3   : > { %3746 = vst [vmem:[#allocation12_spill] sm:$0xff] %v3289_v0  ;;  %v3291_v12 = vadd.f32 %v2097_v58, %v2096_v59 }
 0x2d7   : > { %v2099_v41 = vpop.f32.mrb[24].mxu1 }
 0x2d8   : > { %v2100_v4 = vpop.f32.mrb[25].mxu1 }
 0x2d9   : > { %v3293_v40 = vadd.f32 %v2100_v4, %v2099_v41  ;;  %v2102_v31 = vpop.f32.mrb[26].mxu1 }
 0x2da   : > { %v2103_v23 = vpop.f32.mrb[27].mxu1 }
 0x2db   : > { %v3295_v44 = vadd.f32 %v2103_v23, %v2102_v31 }
 0x300   : > { %v1359_v51 = vpop.xlane.xlu0 %1358 }
 0x301   : > { %v1405_v37 = vsub.f32 %v3103_v54, %v1359_v51  ;;  %v1406_v30 = vsub.f32 %v3107_v13, %v1359_v51 }
 0x302   : > { %v1362_v57 = vpop.xlane.xlu1 %1361 }
 0x303   : > { %v1437_v19 = vmul.f32 1.442695, %v1405_v37  ;;  %v1439_v49 = vmul.f32 1.442695, %v1406_v30  ;;  %v1407_v0 = vsub.f32 %v3111_v28, %v1362_v57  ;;  %v1408_v59 = vsub.f32 %v3117_v21, %v1362_v57 }
 0x305   : > { %2296 = vpow2.f32 %v1437_v19  ;;  %v1441_v58 = vmul.f32 1.442695, %v1407_v0  ;;  %v1443_v41 = vmul.f32 1.442695, %v1408_v59 }
 0x306   : > { %2298 = vpow2.f32 %v1439_v49 }
 0x307   : > { %2300 = vpow2.f32 %v1441_v58 }
 0x308   : > { %2302 = vpow2.f32 %v1443_v41  ;;  %v1365_v4 = vpop.xlane.xlu0 %1364 }
 0x309   : > { %v1409_v31 = vsub.f32 %v3123_v16, %v1365_v4  ;;  %v1410_v54 = vsub.f32 %v3127_v60, %v1365_v4 }
 0x30a   : > { %v1368_v23 = vpop.xlane.xlu1 %1367 }
 0x30b   : > { %v1445_v13 = vmul.f32 1.442695, %v1409_v31  ;;  %v1447_v51 = vmul.f32 1.442695, %v1410_v54  ;;  %v1411_v37 = vsub.f32 %v3131_v50, %v1368_v23  ;;  %v1412_v28 = vsub.f32 %v3137_v42, %v1368_v23 }
 0x30d   : > { %2304 = vpow2.f32 %v1445_v13  ;;  %v1449_v21 = vmul.f32 1.442695, %v1411_v37  ;;  %v1451_v57 = vmul.f32 1.442695, %v1412_v28 }
 0x30e   : > { %2306 = vpow2.f32 %v1447_v51 }
 0x30f   : > { %v2297_v0 = vpop.eup %2296  ;;  %2308 = vpow2.f32 %v1449_v21 }
 0x310   : > { %v2299_v30 = vpop.eup %2298  ;;  %2310 = vpow2.f32 %v1451_v57  ;;  %v1371_v19 = vpop.xlane.xlu0 %1370 }
 0x311   : > { %v2301_v49 = vpop.eup %2300  ;;  %v1413_v16 = vsub.f32 %v3143_v20, %v1371_v19  ;;  %v1414_v60 = vsub.f32 %v3147_v63, %v1371_v19  ;;  %v1501_v59 = vadd.f32 %v2299_v30, %v2297_v0 }
 0x312   : > { %v2303_v58 = vpop.eup %2302  ;;  %v1374_v41 = vpop.xlane.xlu1 %1373 }
 0x313   : > { %v1453_v50 = vmul.f32 1.442695, %v1413_v16  ;;  %v1455_v4 = vmul.f32 1.442695, %v1414_v60  ;;  %1502 = vadd.xlane.f32.xlu0 %v1501_v59  ;;  %v1415_v42 = vsub.f32 %v3151_v25, %v1374_v41  ;;  %v1416_v31 = vsub.f32 %v3157_v2, %v1374_v41 }
 0x314   : > { %v1598_v54 = vpack.c.bf16 %v2303_v58, %v2299_v30  ;;  %v1504_v23 = vadd.f32 %v2303_v58, %v2301_v49 }
 0x315   : > { %2312 = vpow2.f32 %v1453_v50  ;;  %v1457_v13 = vmul.f32 1.442695, %v1415_v42  ;;  %v1459_v51 = vmul.f32 1.442695, %v1416_v31  ;;  %v1597_v31 = vpack.c.bf16 %v2301_v49, %v2297_v0 }
 0x316   : > { %2314 = vpow2.f32 %v1455_v4  ;;  %1693 = vmatprep.mubr.bf16.mxu1 %v1598_v54  ;;  %1505 = vadd.xlane.f32.xlu1 %v1504_v23 }
 0x317   : > { %v2305_v20 = vpop.eup %2304  ;;  %2316 = vpow2.f32 %v1457_v13 }
 0x318   : > { %v2307_v63 = vpop.eup %2306  ;;  %2318 = vpow2.f32 %v1459_v51  ;;  %v1377_v37 = vpop.xlane.xlu0 %1376 }
 0x319   : > { %v2309_v28 = vpop.eup %2308  ;;  %v1417_v21 = vsub.f32 %v3163_v1, %v1377_v37  ;;  %v1418_v25 = vsub.f32 %v3167_v34, %v1377_v37  ;;  %v1507_v57 = vadd.f32 %v2307_v63, %v2305_v20 }
 0x31a   : > { %v2311_v2 = vpop.eup %2310  ;;  %v1380_v30 = vpop.xlane.xlu1 %1379 }
 0x31b   : > { %v1461_v19 = vmul.f32 1.442695, %v1417_v21  ;;  %v1463_v16 = vmul.f32 1.442695, %v1418_v25  ;;  %1508 = vadd.xlane.f32.xlu0 %v1507_v57  ;;  %v1419_v60 = vsub.f32 %v3171_v35, %v1380_v30  ;;  %v1420_v59 = vsub.f32 %v3177_v53, %v1380_v30 }
 0x31c   : > { %v1644_v58 = vpop.permute.xlu0 %1643  ;;  %v1510_v41 = vadd.f32 %v2311_v2, %v2309_v28  ;;  %v1600_v35 = vpack.c.bf16 %v2311_v2, %v2307_v63  ;;  %v1599_v21 = vpack.c.bf16 %v2309_v28, %v2305_v20 }
 0x31d   : > { %2320 = vpow2.f32 %v1461_v19  ;;  %v1465_v50 = vmul.f32 1.442695, %v1419_v60  ;;  %v1467_v4 = vmul.f32 1.442695, %v1420_v59  ;;  %2119 = vmatprep.subr.bf16.mxu1 %v1644_v58 }
 0x31e   : > { %2322 = vpow2.f32 %v1463_v16  ;;  %1511 = vadd.xlane.f32.xlu1 %v1510_v41  ;;  %v1628_v1 = vpop.permute.xlu1 %1627 }
 0x31f   : > { %v2313_v34 = vpop.eup %2312  ;;  %2324 = vpow2.f32 %v1465_v50  ;;  %2120 = vmatpush3.bf16.msra.mxu1 %v1628_v1 }
 0x320   : > { %v2315_v42 = vpop.eup %2314  ;;  %2326 = vpow2.f32 %v1467_v4 }
 0x321   : > { %v2317_v54 = vpop.eup %2316  ;;  %v1513_v23 = vadd.f32 %v2315_v42, %v2313_v34 }
 0x322   : > { %v2319_v13 = vpop.eup %2318  ;;  %1694 = vmatmul.mubr.bf16.vlgmr.msra.gmra.mrb[28].mxu1 %v1597_v31  ;;  %v1601_v49 = vpack.c.bf16 %v2317_v54, %v2313_v34 }
 0x323   : > { %1514 = vadd.xlane.f32.xlu0 %v1513_v23  ;;  %1701 = vmatprep.mubr.bf16.mxu1 %v1600_v35  ;;  %v1516_v53 = vadd.f32 %v2319_v13, %v2317_v54  ;;  %v1602_v30 = vpack.c.bf16 %v2319_v13, %v2315_v42 }
 0x325   : > { %1517 = vadd.xlane.f32.xlu1 %v1516_v53 }
 0x327   : > { %v2321_v51 = vpop.eup %2320 }
 0x328   : > { %v2323_v37 = vpop.eup %2322 }
 0x329   : > { %v2325_v25 = vpop.eup %2324  ;;  %v1519_v57 = vadd.f32 %v2323_v37, %v2321_v51 }
 0x32a   : > { %v2327_v19 = vpop.eup %2326  ;;  %1702 = vmatmul.mubr.bf16.gmra.mrb[32].mxu1 %v1599_v21  ;;  %v1603_v2 = vpack.c.bf16 %v2325_v25, %v2321_v51 }
 0x32b   : > { %1520 = vadd.xlane.f32.xlu0 %v1519_v57  ;;  %1709 = vmatprep.mubr.bf16.mxu1 %v1602_v30  ;;  %v1522_v0 = vadd.f32 %v2327_v19, %v2325_v25  ;;  %v1604_v63 = vpack.c.bf16 %v2327_v19, %v2323_v37 }
 0x32d   : > { %1523 = vadd.xlane.f32.xlu1 %v1522_v0 }
 0x332   : > { %1710 = vmatmul.mubr.bf16.gmra.mrb[36].mxu1 %v1601_v49 }
 0x333   : > { %1717 = vmatprep.mubr.bf16.mxu1 %v1604_v63 }
 0x33a   : > { %1718 = vmatmul.mubr.bf16.gmra.mrb[40].mxu1 %v1603_v2 }
 0x34d   : > { %v1383_v16 = vpop.xlane.xlu0 %1382 }
 0x34e   : > { %v1421_v60 = vsub.f32 %v3201_v24, %v1383_v16  ;;  %v1422_v20 = vsub.f32 %v3205_v17, %v1383_v16 }
 0x34f   : > { %v1386_v28 = vpop.xlane.xlu1 %1385 }
 0x350   : > { %v1469_v59 = vmul.f32 1.442695, %v1421_v60  ;;  %v1471_v58 = vmul.f32 1.442695, %v1422_v20  ;;  %v1423_v41 = vsub.f32 %v3211_v55, %v1386_v28  ;;  %v1424_v50 = vsub.f32 %v3215_v45, %v1386_v28 }
 0x351   : > { %v1389_v4 = vpop.xlane.xlu0 %1388 }
 0x352   : > { %2328 = vpow2.f32 %v1469_v59  ;;  %v1473_v1 = vmul.f32 1.442695, %v1423_v41  ;;  %v1475_v34 = vmul.f32 1.442695, %v1424_v50  ;;  %v1425_v42 = vsub.f32 %v3219_v29, %v1389_v4 }
 0x353   : > { %2330 = vpow2.f32 %v1471_v58  ;;  %v1426_v31 = vsub.f32 %v3223_v43, %v1389_v4  ;;  %v1398_v54 = vpop.xlane.xlu1 %1397 }
 0x354   : > { %2332 = vpow2.f32 %v1473_v1  ;;  %v1477_v24 = vmul.f32 1.442695, %v1425_v42  ;;  %v1431_v17 = vsub.f32 %v3229_v6, %v1398_v54  ;;  %v1432_v55 = vsub.f32 %v3233_v18, %v1398_v54 }
 0x355   : > { %2334 = vpow2.f32 %v1475_v34  ;;  %v1479_v23 = vmul.f32 1.442695, %v1426_v31  ;;  %v1392_v35 = vpop.xlane.xlu0 %1391 }
 0x356   : > { %2336 = vpow2.f32 %v1477_v24  ;;  %v1427_v45 = vsub.f32 %v3243_v38, %v1392_v35  ;;  %v1428_v13 = vsub.f32 %v3249_v47, %v1392_v35  ;;  %v1489_v29 = vmul.f32 1.442695, %v1431_v17 }
 0x357   : > { %2338 = vpow2.f32 %v1479_v23  ;;  %v1491_v51 = vmul.f32 1.442695, %v1432_v55  ;;  %v1404_v18 = vpop.xlane.xlu1 %1403 }
 0x358   : > { %v1481_v53 = vmul.f32 1.442695, %v1427_v45  ;;  %v1483_v43 = vmul.f32 1.442695, %v1428_v13  ;;  %v1435_v4 = vsub.f32 %v3253_v62, %v1404_v18 }
 0x359   : > { %v1395_v37 = vpop.xlane.xlu0 %1394 }
 0x35a   : > { %2340 = vpow2.f32 %v1481_v53  ;;  %v1429_v21 = vsub.f32 %v3263_v36, %v1395_v37  ;;  %v1430_v6 = vsub.f32 %v3267_v39, %v1395_v37  ;;  %v1436_v36 = vsub.f32 %v3257_v10, %v1404_v18 }
 0x35b   : > { %2342 = vpow2.f32 %v1483_v43  ;;  %v1497_v17 = vmul.f32 1.442695, %v1435_v4 }
 0x35c   : > { %v2329_v25 = vpop.eup %2328  ;;  %2344 = vpow2.f32 %v1489_v29  ;;  %v1485_v57 = vmul.f32 1.442695, %v1429_v21  ;;  %v1487_v38 = vmul.f32 1.442695, %v1430_v6 }
 0x35d   : > { %v2331_v30 = vpop.eup %2330  ;;  %2346 = vpow2.f32 %v1491_v51  ;;  %v1401_v19 = vpop.xlane.xlu0 %1400 }
 0x35e   : > { %v2333_v47 = vpop.eup %2332  ;;  %2348 = vpow2.f32 %v1485_v57  ;;  %v1433_v0 = vsub.f32 %v3277_v5, %v1401_v19  ;;  %v1434_v49 = vsub.f32 %v3281_v22, %v1401_v19  ;;  %v1525_v63 = vadd.f32 %v2331_v30, %v2329_v25 }
 0x35f   : > { %v2335_v2 = vpop.eup %2334  ;;  %2350 = vpow2.f32 %v1487_v38  ;;  %v1605_v39 = vpack.c.bf16 %v2333_v47, %v2329_v25  ;;  %v1499_v5 = vmul.f32 1.442695, %v1436_v36 }
 0x360   : > { %v2337_v16 = vpop.eup %2336  ;;  %v1493_v60 = vmul.f32 1.442695, %v1433_v0  ;;  %v1495_v20 = vmul.f32 1.442695, %v1434_v49  ;;  %1526 = vadd.xlane.f32.xlu0 %v1525_v63  ;;  %v1606_v28 = vpack.c.bf16 %v2335_v2, %v2331_v30  ;;  %v1528_v59 = vadd.f32 %v2335_v2, %v2333_v47 }
 0x361   : > { %v2339_v58 = vpop.eup %2338 }
 0x362   : > { %2352 = vpow2.f32 %v1493_v60  ;;  %1725 = vmatprep.mubr.bf16.mxu1 %v1606_v28  ;;  %1529 = vadd.xlane.f32.xlu1 %v1528_v59  ;;  %v1531_v41 = vadd.f32 %v2339_v58, %v2337_v16 }
 0x363   : > { %2354 = vpow2.f32 %v1495_v20  ;;  %1726 = vmatmul.mubr.bf16.gmra.mrb[44].mxu1 %v1605_v39 }
 0x364   : > { %v2341_v22 = vpop.eup %2340  ;;  %1532 = vadd.xlane.f32.xlu0 %v1531_v41  ;;  %2356 = vpow2.f32 %v1499_v5 }
 0x365   : > { %v2343_v50 = vpop.eup %2342  ;;  %v1607_v24 = vpack.c.bf16 %v2341_v22, %v2337_v16  ;;  %2358 = vpow2.f32 %v1497_v17 }
 0x366   : > { %v2345_v10 = vpop.eup %2344  ;;  %v1608_v1 = vpack.c.bf16 %v2343_v50, %v2339_v58  ;;  %v1534_v34 = vadd.f32 %v2343_v50, %v2341_v22 }
 0x367   : > { %v2347_v42 = vpop.eup %2346 }
 0x368   : > { %v2349_v31 = vpop.eup %2348  ;;  %1733 = vmatprep.mubr.bf16.mxu1 %v1608_v1  ;;  %1535 = vadd.xlane.f32.xlu1 %v1534_v34  ;;  %v1540_v35 = vadd.f32 %v2347_v42, %v2345_v10 }
 0x369   : > { %v2351_v54 = vpop.eup %2350  ;;  %v1609_v53 = vpack.c.bf16 %v2345_v10, %v2349_v31 }
 0x36a   : > { %v1537_v23 = vadd.f32 %v2351_v54, %v2349_v31  ;;  %v1610_v55 = vpack.c.bf16 %v2347_v42, %v2351_v54 }
 0x36b   : > { %1734 = vmatmul.mubr.bf16.gmra.mrb[48].mxu1 %v1607_v24 }
 0x36c   : > { %v2353_v45 = vpop.eup %2352  ;;  %1538 = vadd.xlane.f32.xlu0 %v1537_v23  ;;  %1741 = vmatprep.mubr.bf16.mxu1 %v1610_v55 }
 0x36d   : > { %v2355_v13 = vpop.eup %2354  ;;  %1541 = vadd.xlane.f32.xlu1 %v1540_v35 }
 0x36e   : > { %v1543_v62 = vadd.f32 %v2355_v13, %v2353_v45  ;;  %v2357_v29 = vpop.eup %2356 }
 0x36f   : > { %v1612_v51 = vpack.c.bf16 %v2357_v29, %v2355_v13  ;;  %v2359_v43 = vpop.eup %2358 }
 0x370   : > { %1544 = vadd.xlane.f32.xlu0 %v1543_v62  ;;  %v1611_v37 = vpack.c.bf16 %v2359_v43, %v2353_v45  ;;  %v1546_v21 = vadd.f32 %v2359_v43, %v2357_v29 }
 0x371   : > { %871 = vadd.xlane.f32.xlu1 %v2979_v15 }
 0x373   : > { %1742 = vmatmul.mubr.bf16.gmra.mrb[52].mxu1 %v1609_v53 }
 0x374   : > { %868 = vadd.xlane.f32.xlu0 %v2972_v52  ;;  %1749 = vmatprep.mubr.bf16.mxu1 %v1612_v51 }
 0x375   : > { %877 = vadd.xlane.f32.xlu1 %v3019_v9 }
 0x378   : > { %874 = vadd.xlane.f32.xlu0 %v3021_v26 }
 0x379   : > { %883 = vadd.xlane.f32.xlu1 %v3038_v33 }
 0x37b   : > { %1750 = vmatmul.mubr.bf16.gmra.mrb[56].mxu1 %v1611_v37 }
 0x37c   : > { %880 = vadd.xlane.f32.xlu0 %v3071_v3 }
 0x37d   : > { %1547 = vadd.xlane.f32.xlu1 %v1546_v21 }
 0x380   : > { %886 = vadd.xlane.f32.xlu0 %v3080_v11 }
 0x381   : > { %889 = vadd.xlane.f32.xlu1 %v3057_v32 }
 0x384   : > { %892 = vadd.xlane.f32.xlu0 %v3083_v46 }
 0x385   : > { %895 = vadd.xlane.f32.xlu1 %v3073_v56 }
 0x388   : > { %898 = vadd.xlane.f32.xlu0 %v3087_v7 }
 0x389   : > { %901 = vadd.xlane.f32.xlu1 %v3085_v14 }
 0x38c   : > { %904 = vadd.xlane.f32.xlu0 %v3089_v8 }
 0x38d   : > { %907 = vadd.xlane.f32.xlu1 %v3091_v61 }
 0x390   : > { %910 = vadd.xlane.f32.xlu0 %v3093_v27 }
 0x391   : > { %913 = vadd.xlane.f32.xlu1 %v3095_v48 }
 0x3a0   : > { %v1503_v52 = vpop.xlane.xlu0 %1502 }
 0x3a1   : > { %vm1549_vm7 = vcmp.gt.f32.partialorder %v1503_v52, 0.0 }
 0x3a2   : > { %v1565_v56 = vsel %vm1549_vm7, %v1503_v52, 1.0 }
 0x3a3   : > { %v1506_v15 = vpop.xlane.xlu1 %1505  ;;  %2360 = vrcp.f32 %v1565_v56 }
 0x3a4   : > { %vm1550_vm8 = vcmp.gt.f32.partialorder %v1506_v15, 0.0 }
 0x3a5   : > { %v1566_v11 = vsel %vm1550_vm8, %v1506_v15, 1.0 }
 0x3a6   : > { %2362 = vrcp.f32 %v1566_v11 }
 0x3a8   : > { %v1509_v9 = vpop.xlane.xlu0 %1508 }
 0x3a9   : > { %vm1551_vm10 = vcmp.gt.f32.partialorder %v1509_v9, 0.0 }
 0x3aa   : > { %v1567_v8 = vsel %vm1551_vm10, %v1509_v9, 1.0 }
 0x3ab   : > { %v1512_v26 = vpop.xlane.xlu1 %1511  ;;  %2364 = vrcp.f32 %v1567_v8 }
 0x3ac   : > { %vm1552_vm11 = vcmp.gt.f32.partialorder %v1512_v26, 0.0 }
 0x3ad   : > { %v1568_v25 = vsel %vm1552_vm11, %v1512_v26, 1.0  ;;  %v2361_v30 = vpop.eup %2360 }
 0x3ae   : > { %2366 = vrcp.f32 %v1568_v25 }
 0x3b0   : > { %v1515_v33 = vpop.xlane.xlu0 %1514  ;;  %v2363_v49 = vpop.eup %2362 }
 0x3b1   : > { %vm1553_vm15 = vcmp.gt.f32.partialorder %v1515_v33, 0.0 }
 0x3b2   : > { %v1518_v32 = vpop.xlane.xlu1 %1517  ;;  %v1569_v2 = vsel %vm1553_vm15, %v1515_v33, 1.0 }
 0x3b3   : > { %vm1554_vm1 = vcmp.gt.f32.partialorder %v1518_v32, 0.0  ;;  %2368 = vrcp.f32 %v1569_v2 }
 0x3b4   : > { %v1570_v39 = vsel %vm1554_vm1, %v1518_v32, 1.0 }
 0x3b5   : > { %v2365_v41 = vpop.eup %2364  ;;  %2370 = vrcp.f32 %v1570_v39 }
 0x3b8   : > { %v1521_v3 = vpop.xlane.xlu0 %1520  ;;  %v2367_v34 = vpop.eup %2366 }
 0x3b9   : > { %vm1555_vm3 = vcmp.gt.f32.partialorder %v1521_v3, 0.0 }
 0x3ba   : > { %v1524_v46 = vpop.xlane.xlu1 %1523  ;;  %v1571_v1 = vsel %vm1555_vm3, %v1521_v3, 1.0 }
 0x3bb   : > { %vm1556_vm14 = vcmp.gt.f32.partialorder %v1524_v46, 0.0  ;;  %2372 = vrcp.f32 %v1571_v1 }
 0x3bc   : > { %v1572_v42 = vsel %vm1556_vm14, %v1524_v46, 1.0 }
 0x3bd   : > { %v2369_v45 = vpop.eup %2368  ;;  %2374 = vrcp.f32 %v1572_v42 }
 0x3bf   : > { %v2371_v51 = vpop.eup %2370 }
 0x3c5   : > { %v2373_v32 = vpop.eup %2372 }
 0x3c7   : > { %v2375_v8 = vpop.eup %2374 }
 0x3ed   : > { %v3345_v14 = vpop.xlane.xlu0 %1526 }
 0x3ee   : > { %vm1557_vm12 = vcmp.gt.f32.partialorder %v3345_v14, 0.0 }
 0x3ef   : > { %v3347_v7 = vpop.xlane.xlu1 %1529 }
 0x3f0   : > { %vm1558_vm13 = vcmp.gt.f32.partialorder %v3347_v7, 0.0 }
 0x3f1   : > { %v3349_v61 = vpop.xlane.xlu0 %1532 }
 0x3f2   : > { %vm1559_vm7 = vcmp.gt.f32.partialorder %v3349_v61, 0.0 }
 0x3f5   : > { %v3351_v27 = vpop.xlane.xlu1 %1535  ;;  %v2121_v48 = vpop.f32.mrb[28].mxu1 }
 0x3f6   : > { %v2122_v6 = vpop.f32.mrb[29].mxu1  ;;  %vm1560_vm8 = vcmp.gt.f32.partialorder %v3351_v27, 0.0 }
 0x3f7   : > { %v2123_v18 = vadd.f32 %v2122_v6, %v2121_v48  ;;  %v2124_v57 = vpop.f32.mrb[30].mxu1 }
 0x3f8   : > { %v2125_v38 = vpop.f32.mrb[31].mxu1 }
 0x3f9   : > { %v1758_v19 = vmul.f32 %v2361_v30, %v2123_v18  ;;  %v3353_v47 = vpop.xlane.xlu0 %1538  ;;  %v2126_v0 = vadd.f32 %v2125_v38, %v2124_v57 }
 0x3fa   : > { %v3355_v63 = vpop.xlane.xlu1 %1541  ;;  %vm1561_vm10 = vcmp.gt.f32.partialorder %v3353_v47, 0.0 }
 0x3fb   : > { %v1759_v36 = vmul.f32 %v2363_v49, %v2126_v0  ;;  %1790 = vrot.lane.b32.xlu0 %v1758_v19, %s2436_s12  ;;  %vm1562_vm11 = vcmp.gt.f32.partialorder %v3355_v63, 0.0 }
 0x3fd   : > { %v3358_v16 = vpop.xlane.xlu0 %1544  ;;  %v2127_v60 = vpop.f32.mrb[32].mxu1  ;;  %1792 = vrot.lane.b32.xlu1 %v1759_v36, %s2436_s12 }
 0x3fe   : > { %v3361_v20 = vpop.xlane.xlu1 %871  ;;  %v2128_v28 = vpop.f32.mrb[33].mxu1  ;;  %vm1563_vm15 = vcmp.gt.f32.partialorder %v3358_v16, 0.0 }
 0x3ff   : > { %v2129_v59 = vadd.f32 %v2128_v28, %v2127_v60  ;;  %v2130_v58 = vpop.f32.mrb[34].mxu1  ;;  %v3747_v28 = vld [vmem:[#allocation5_spill] sm:$0xff]  ;;  %vm916_vm14 = vcmp.gt.f32.partialorder %v3361_v20, 0.0 }
 0x400   : > { %v2131_v5 = vpop.f32.mrb[35].mxu1 }
 0x401   : > { %v1760_v22 = vmul.f32 %v2365_v41, %v2129_v59  ;;  %v3363_v50 = vpop.xlane.xlu0 %868  ;;  %v2132_v10 = vadd.f32 %v2131_v5, %v2130_v58  ;;  %v3748_v58 = vld [vmem:[#allocation6_spill] sm:$0xff] }
 0x402   : > { %v3365_v4 = vpop.xlane.xlu1 %877  ;;  %vm915_vm3 = vcmp.gt.f32.partialorder %v3363_v50, 0.0 }
 0x403   : > { %1794 = vrot.lane.b32.xlu1 %v1760_v22, %s2436_s12  ;;  %v1761_v31 = vmul.f32 %v2367_v34, %v2132_v10  ;;  %v3749_v10 = vld [vmem:[#allocation10_spill] sm:$0xff]  ;;  %v3750_v34 = vld [vmem:[#allocation11_spill] sm:$0xff] }
 0x405   : > { %v3368_v54 = vpop.xlane.xlu0 %874  ;;  %v2133_v24 = vpop.f32.mrb[36].mxu1 }
 0x406   : > { %v3370_v17 = vpop.xlane.xlu1 %883  ;;  %v2134_v23 = vpop.f32.mrb[37].mxu1 }
 0x407   : > { %v2135_v55 = vadd.f32 %v2134_v23, %v2133_v24  ;;  %v2136_v35 = vpop.f32.mrb[38].mxu1  ;;  %1796 = vrot.lane.b32.xlu1 %v1761_v31, %s2436_s12  ;;  %v3751_v23 = vld [vmem:[#allocation12_spill] sm:$0xff] }
 0x408   : > { %v2137_v13 = vpop.f32.mrb[39].mxu1 }
 0x409   : > { %v1762_v62 = vmul.f32 %v2369_v45, %v2135_v55  ;;  %v3373_v29 = vpop.xlane.xlu0 %880  ;;  %v2138_v53 = vadd.f32 %v2137_v13, %v2136_v35  ;;  %v1573_v45 = vsel %vm1557_vm12, %v3345_v14, 1.0  ;;  %v1574_v13 = vsel %vm1558_vm13, %v3347_v7, 1.0 }
 0x40a   : > { %v3375_v43 = vpop.xlane.xlu1 %1547  ;;  %vm3754_vm13 = vcmask 261120  }
 0x40b   : > { %v1763_v37 = vmul.f32 %v2371_v51, %v2138_v53  ;;  %1798 = vrot.lane.b32.xlu0 %v1762_v62, %s2436_s12  ;;  %v1575_v62 = vsel %vm1559_vm7, %v3349_v61, 1.0  ;;  %v1576_v53 = vsel %vm1560_vm8, %v3351_v27, 1.0  ;;  %v1578_v27 = vsel %vm1562_vm11, %v3355_v63, 1.0  ;;  %vm3756_vm7 = vmmov %vm3754_vm13 }
 0x40c   : > { %vm1564_vm1 = vcmp.gt.f32.partialorder %v3375_v43, 0.0  ;;  %vm3758_vm8 = vmmov %vm3756_vm7 }
 0x40d   : > { %v3378_v21 = vpop.xlane.xlu0 %886  ;;  %v2139_v52 = vpop.f32.mrb[40].mxu1  ;;  %1800 = vrot.lane.b32.xlu1 %v1763_v37, %s2436_s12  ;;  %vm3762_vm11 = vmmov %vm3756_vm7 }
 0x40e   : > { %v3381_v15 = vpop.xlane.xlu1 %889  ;;  %v2140_v9 = vpop.f32.mrb[41].mxu1 }
 0x40f   : > { %v2141_v26 = vadd.f32 %v2140_v9, %v2139_v52  ;;  %v2142_v33 = vpop.f32.mrb[42].mxu1  ;;  %vm922_vm12 = vcmp.gt.f32.partialorder %v3381_v15, 0.0 }
 0x410   : > { %v2143_v3 = vpop.f32.mrb[43].mxu1 }
 0x411   : > { %v1764_v56 = vmul.f32 %v2373_v32, %v2141_v26  ;;  %v893_v11 = vpop.xlane.xlu0 %892  ;;  %v2144_v46 = vadd.f32 %v2143_v3, %v2142_v33  ;;  %v1577_v32 = vsel %vm1561_vm10, %v3353_v47, 1.0  ;;  %vm3761_vm10 = vmmov %vm3756_vm7 }
 0x412   : > { %vm923_vm0 = vcmp.gt.f32.partialorder %v893_v11, 0.0  ;;  %v896_v48 = vpop.xlane.xlu1 %895 }
 0x413   : > { %v939_v6 = vsel %vm923_vm0, %v893_v11, 1.0  ;;  %v1765_v25 = vmul.f32 %v2375_v8, %v2144_v46  ;;  %vm924_vm9 = vcmp.gt.f32.partialorder %v896_v48, 0.0  ;;  %1802 = vrot.lane.b32.xlu0 %v1764_v56, %s2436_s12  ;;  %vm917_vm0 = vcmp.gt.f32.partialorder %v3368_v54, 0.0 }
 0x414   : > { %2376 = vrcp.f32 %v939_v6  ;;  %v940_v18 = vsel %vm924_vm9, %v896_v48, 1.0  ;;  %vm918_vm9 = vcmp.gt.f32.partialorder %v3365_v4, 0.0 }
 0x415   : > { %2378 = vrcp.f32 %v940_v18  ;;  %v899_v57 = vpop.xlane.xlu0 %898  ;;  %1804 = vrot.lane.b32.xlu1 %v1765_v25, %s2436_s12  ;;  %v1579_v18 = vsel %vm1563_vm15, %v3358_v16, 1.0  ;;  %vm3764_vm15 = vmmov %vm3756_vm7 }
 0x416   : > { %vm925_vm5 = vcmp.gt.f32.partialorder %v899_v57, 0.0  ;;  %v902_v30 = vpop.xlane.xlu1 %901 }
 0x417   : > { %v941_v38 = vsel %vm925_vm5, %v899_v57, 1.0  ;;  %vm926_vm4 = vcmp.gt.f32.partialorder %v902_v30, 0.0  ;;  %v1580_v57 = vsel %vm1564_vm1, %v3375_v43, 1.0  ;;  %vm919_vm5 = vcmp.gt.f32.partialorder %v3373_v29, 0.0  ;;  %vm3766_vm1 = vmmov %vm3756_vm7 }
 0x418   : > { %2380 = vrcp.f32 %v941_v38  ;;  %v942_v19 = vsel %vm926_vm4, %v902_v30, 1.0  ;;  %vm920_vm4 = vcmp.gt.f32.partialorder %v3370_v17, 0.0 }
 0x419   : > { %2382 = vrcp.f32 %v942_v19  ;;  %v905_v0 = vpop.xlane.xlu0 %904 }
 0x41a   : > { %vm927_vm2 = vcmp.gt.f32.partialorder %v905_v0, 0.0  ;;  %v908_v49 = vpop.xlane.xlu1 %907 }
 0x41b   : > { %v943_v2 = vsel %vm927_vm2, %v905_v0, 1.0  ;;  %vm928_vm6 = vcmp.gt.f32.partialorder %v908_v49, 0.0  ;;  %vm1838_vm2 = vcmask 130048  }
 0x41c   : > { %2384 = vrcp.f32 %v943_v2  ;;  %v944_v36 = vsel %vm928_vm6, %v908_v49, 1.0  ;;  %vm921_vm6 = vcmp.gt.f32.partialorder %v3378_v21, 0.0 }
 0x41d   : > { %2386 = vrcp.f32 %v944_v36 }
 0x41e   : > { %v2377_v39 = vpop.eup %2376  ;;  %2388 = vrcp.f32 %v1573_v45  ;;  %v931_v45 = vsel %vm915_vm3, %v3363_v50, 1.0  ;;  %vm3767_vm3 = vmmov %vm3766_vm1 }
 0x41f   : > { %v2379_v60 = vpop.eup %2378  ;;  %v3386_v59 = vmul.f32 %v2377_v39, %v3747_v28  ;;  %2390 = vrcp.f32 %v1574_v13  ;;  %v932_v13 = vsel %vm916_vm14, %v3361_v20, 1.0  ;;  %v3439_v20 = vpop.xlane.xlu1 %913 }
 0x420   : > { %v3389_v41 = vmul.f32 %v2379_v60, %v3748_v58  ;;  %2392 = vrcp.f32 %v1575_v62  ;;  %v933_v62 = vsel %vm917_vm0, %v3368_v54, 1.0  ;;  %v3445_v54 = vld [vmem:[%s3548_s3] ss:$0 sm:$0xff]  ;;  %vm930_vm0 = vcmp.gt.f32.partialorder %v3439_v20, 0.0 }
 0x421   : > { %2394 = vrcp.f32 %v1576_v53  ;;  %v934_v53 = vsel %vm918_vm9, %v3365_v4, 1.0  ;;  %v3752_v4 = vld [vmem:[#allocation26_spill] sm:$0xff]  ;;  %vm3768_vm9 = vmmov %vm3766_vm1 }
 0x422   : > { %v2381_v5 = vpop.eup %2380  ;;  %2396 = vrcp.f32 %v1577_v32 }
 0x423   : > { %v2383_v22 = vpop.eup %2382  ;;  %v3392_v1 = vmul.f32 %v2381_v5, %v3749_v10  ;;  %2398 = vrcp.f32 %v1578_v27 }
 0x424   : > { %v3395_v42 = vmul.f32 %v2383_v22, %v3750_v34  ;;  %2400 = vrcp.f32 %v1579_v18 }
 0x425   : > { %2402 = vrcp.f32 %v1580_v57 }
 0x426   : > { %v2385_v31 = vpop.eup %2384  ;;  %2404 = vrcp.f32 %v931_v45 }
 0x427   : > { %v2387_v24 = vpop.eup %2386  ;;  %v3398_v55 = vmul.f32 %v2385_v31, %v3751_v23  ;;  %2406 = vrcp.f32 %v932_v13 }
 0x428   : > { %v3401_v35 = vmul.f32 %v2387_v24, %v3291_v12  ;;  %v2389_v9 = vpop.eup %2388  ;;  %2408 = vrcp.f32 %v933_v62 }
 0x429   : > { %v2391_v33 = vpop.eup %2390  ;;  %2410 = vrcp.f32 %v934_v53  ;;  %v3765_v53 = vld [vmem:[#allocation9_spill] sm:$0xff] }
 0x42a   : > { %v2393_v8 = vpop.eup %2392 }
 0x42b   : > { %v2395_v47 = vpop.eup %2394 }
 0x42c   : > { %v2397_v49 = vpop.eup %2396 }
 0x42d   : > { %v2399_v60 = vpop.eup %2398 }
 0x42e   : > { %v2401_v22 = vpop.eup %2400 }
 0x42f   : > { %v2403_v24 = vpop.eup %2402 }
 0x436   : > { %v2145_v12 = vpop.f32.mrb[44].mxu1 }
 0x437   : > { %v2146_v51 = vpop.f32.mrb[45].mxu1 }
 0x438   : > { %v2147_v37 = vadd.f32 %v2146_v51, %v2145_v12  ;;  %v2148_v52 = vpop.f32.mrb[46].mxu1  ;;  %v2405_v12 = vpop.eup %2404 }
 0x439   : > { %v2149_v14 = vpop.f32.mrb[47].mxu1  ;;  %v3436_v51 = vpop.xlane.xlu0 %910 }
 0x43a   : > { %v1766_v7 = vmul.f32 %v2389_v9, %v2147_v37  ;;  %v2150_v26 = vadd.f32 %v2149_v14, %v2148_v52  ;;  %v2407_v50 = vpop.eup %2406  ;;  %v935_v37 = vsel %vm919_vm5, %v3373_v29, 1.0  ;;  %v1172_v52 = vmul.f32 %v2405_v12, %v3752_v4  ;;  %vm3769_vm5 = vmmov %vm3766_vm1 }
 0x43b   : > { %v936_v14 = vsel %vm920_vm4, %v3370_v17, 1.0  ;;  %2412 = vrcp.f32 %v935_v37  ;;  %v2409_v27 = vpop.eup %2408  ;;  %vm929_vm14 = vcmp.gt.f32.partialorder %v3436_v51, 0.0  ;;  %vm3770_vm4 = vmmov %vm3766_vm1 }
 0x43c   : > { %v1767_v61 = vmul.f32 %v2391_v33, %v2150_v26  ;;  %1806 = vrot.lane.b32.xlu0 %v1766_v7, %s2436_s12  ;;  %v3753_v26 = vld [vmem:[#allocation27_spill] sm:$0xff]  ;;  %2414 = vrcp.f32 %v936_v14 }
 0x43d   : > { %v1173_v33 = vmul.f32 %v2407_v50, %v3753_v26 }
 0x43e   : > { %v2151_v3 = vpop.f32.mrb[48].mxu1  ;;  %1808 = vrot.lane.b32.xlu1 %v1767_v61, %s2436_s12 }
 0x43f   : > { %v2152_v56 = vpop.f32.mrb[49].mxu1 }
 0x440   : > { %v2153_v11 = vadd.f32 %v2152_v56, %v2151_v3  ;;  %v2154_v46 = vpop.f32.mrb[50].mxu1 }
 0x441   : > { %v2155_v48 = vpop.f32.mrb[51].mxu1 }
 0x442   : > { %v1768_v6 = vmul.f32 %v2393_v8, %v2153_v11  ;;  %v2156_v25 = vadd.f32 %v2155_v48, %v2154_v46  ;;  %v937_v11 = vsel %vm921_vm6, %v3378_v21, 1.0  ;;  %v3755_v46 = vld [vmem:[#allocation4_spill] sm:$0xff]  ;;  %v2411_v48 = vpop.eup %2410  ;;  %vm3771_vm6 = vmmov %vm3766_vm1 }
 0x443   : > { %v1174_v8 = vmul.f32 %v2409_v27, %v3755_v46  ;;  %2416 = vrcp.f32 %v937_v11 }
 0x444   : > { %v1769_v63 = vmul.f32 %v2395_v47, %v2156_v25  ;;  %1810 = vrot.lane.b32.xlu0 %v1768_v6, %s2436_s12  ;;  %v938_v25 = vsel %vm922_vm12, %v3381_v15, 1.0  ;;  %vm3772_vm12 = vmmov %vm3766_vm1 }
 0x445   : > { %2418 = vrcp.f32 %v938_v25 }
 0x446   : > { %v2157_v30 = vpop.f32.mrb[52].mxu1  ;;  %1812 = vrot.lane.b32.xlu1 %v1769_v63, %s2436_s12  ;;  %v3757_v63 = vld [vmem:[#allocation7_spill] sm:$0xff] }
 0x447   : > { %v2158_v38 = vpop.f32.mrb[53].mxu1  ;;  %v1175_v57 = vmul.f32 %v2411_v48, %v3757_v63 }
 0x448   : > { %v2159_v19 = vadd.f32 %v2158_v38, %v2157_v30  ;;  %v2160_v0 = vpop.f32.mrb[54].mxu1  ;;  %v2413_v30 = vpop.eup %2412 }
 0x449   : > { %v2161_v2 = vpop.f32.mrb[55].mxu1 }
 0x44a   : > { %v1770_v36 = vmul.f32 %v2397_v49, %v2159_v19  ;;  %v2162_v39 = vadd.f32 %v2161_v2, %v2160_v0  ;;  %v2415_v0 = vpop.eup %2414  ;;  %v3759_v49 = vld [vmem:[#allocation2_spill] sm:$0xff] }
 0x44b   : > { %v1176_v2 = vmul.f32 %v2413_v30, %v3759_v49 }
 0x44c   : > { %v1771_v28 = vmul.f32 %v2399_v60, %v2162_v39  ;;  %1814 = vrot.lane.b32.xlu0 %v1770_v36, %s2436_s12 }
 0x44e   : > { %v2163_v16 = vpop.f32.mrb[56].mxu1  ;;  %1816 = vrot.lane.b32.xlu1 %v1771_v28, %s2436_s12  ;;  %v3760_v28 = vld [vmem:[#allocation3_spill] sm:$0xff] }
 0x44f   : > { %v2164_v43 = vpop.f32.mrb[57].mxu1 }
 0x450   : > { %v2165_v58 = vadd.f32 %v2164_v43, %v2163_v16  ;;  %v2166_v5 = vpop.f32.mrb[58].mxu1  ;;  %v1177_v16 = vmul.f32 %v2415_v0, %v3760_v28 }
 0x451   : > { %v2167_v10 = vpop.f32.mrb[59].mxu1 }
 0x452   : > { %v1772_v34 = vmul.f32 %v2401_v22, %v2165_v58  ;;  %v2168_v31 = vadd.f32 %v2167_v10, %v2166_v5  ;;  %v2417_v22 = vpop.eup %2416 }
 0x454   : > { %v1773_v23 = vmul.f32 %v2403_v24, %v2168_v31  ;;  %1818 = vrot.lane.b32.xlu0 %v1772_v34, %s2436_s12  ;;  %v2419_v31 = vpop.eup %2418 }
 0x455   : > { %v1179_v12 = vmul.f32 %v2419_v31, %v3765_v53 }
 0x456   : > { %1820 = vrot.lane.b32.xlu1 %v1773_v23, %s2436_s12  ;;  %v3763_v23 = vld [vmem:[#allocation8_spill] sm:$0xff] }
 0x457   : > { %v1178_v45 = vmul.f32 %v2417_v22, %v3763_v23 }
 0x46d   : > { %v1791_v9 = vpop.permute.xlu0 %1790 }
 0x46e   : > { %v1839_v7 = vsel %vm1838_vm2, %v1172_v52, %v1791_v9 }
 0x46f   : > { %v1861_v32 = vadd.f32 %v3445_v54, %v1839_v7  ;;  %v1793_v61 = vpop.permute.xlu1 %1792 }
 0x470   : > { %v1840_v29 = vsel %vm1838_vm2, %v1173_v33, %v1793_v61 }
 0x471   : > { %v1877_v17 = vmax.f32 %v1861_v32, 0.0  ;;  %v1862_v3 = vadd.f32 %v3445_v54, %v1840_v29 }
 0x473   : > { %1893 = vst.msk [vmem:[%s3456_s21] sm:$0xff] %vm3754_vm13, %v1877_v17  ;;  %v1878_v56 = vmax.f32 %v1862_v3, 0.0  ;;  %vm3773_vm13 = vmmov %vm3766_vm1 }
 0x475   : > { %1894 = vst.msk [vmem:[%s3456_s21 + $0x8] sm:$0xff] %vm3756_vm7, %v1878_v56  ;;  %v1795_v6 = vpop.permute.xlu1 %1794  ;;  %v946_v56 = vsel %vm930_vm0, %v3439_v20, 1.0  ;;  %vm3774_vm7 = vmmov %vm3766_vm1 }
 0x476   : > { %v1841_v47 = vsel %vm1838_vm2, %v1174_v8, %v1795_v6 }
 0x477   : > { %v1863_v18 = vadd.f32 %v3445_v54, %v1841_v47 }
 0x479   : > { %v1879_v21 = vmax.f32 %v1863_v18, 0.0  ;;  %v1797_v38 = vpop.permute.xlu1 %1796 }
 0x47a   : > { %v1842_v19 = vsel %vm1838_vm2, %v1175_v57, %v1797_v38 }
 0x47b   : > { %1895 = vst.msk [vmem:[%s3456_s21 + $0x10] sm:$0xff] %vm3758_vm8, %v1879_v21  ;;  %v1864_v15 = vadd.f32 %v3445_v54, %v1842_v19  ;;  %vm3775_vm8 = vmmov %vm3766_vm1 }
 0x47d   : > { %v1880_v36 = vmax.f32 %v1864_v15, 0.0  ;;  %v1799_v39 = vpop.permute.xlu0 %1798 }
 0x47e   : > { %v1843_v60 = vsel %vm1838_vm2, %v1176_v2, %v1799_v39 }
 0x47f   : > { %1896 = vst.msk [vmem:[%s3456_s21 + $0x18] sm:$0xff] %vm3761_vm10, %v1880_v36  ;;  %v1865_v43 = vadd.f32 %v3445_v54, %v1843_v60  ;;  %v1801_v58 = vpop.permute.xlu1 %1800 }
 0x480   : > { %v1844_v5 = vsel %vm1838_vm2, %v1177_v16, %v1801_v58 }
 0x481   : > { %v1881_v10 = vmax.f32 %v1865_v43, 0.0  ;;  %v1866_v34 = vadd.f32 %v3445_v54, %v1844_v5 }
 0x483   : > { %1897 = vst.msk [vmem:[%s3456_s21 + $0x20] sm:$0xff] %vm3762_vm11, %v1881_v10  ;;  %v1882_v24 = vmax.f32 %v1866_v34, 0.0 }
 0x485   : > { %1898 = vst.msk [vmem:[%s3456_s21 + $0x28] sm:$0xff] %vm3764_vm15, %v1882_v24  ;;  %v1803_v13 = vpop.permute.xlu0 %1802 }
 0x486   : > { %v1845_v62 = vsel %vm1838_vm2, %v1178_v45, %v1803_v13 }
 0x487   : > { %v1867_v50 = vadd.f32 %v3445_v54, %v1845_v62  ;;  %v1805_v37 = vpop.permute.xlu1 %1804 }
 0x488   : > { %v1846_v4 = vsel %vm1838_vm2, %v1179_v12, %v1805_v37 }
 0x489   : > { %v1883_v52 = vmax.f32 %v1867_v50, 0.0  ;;  %v1868_v9 = vadd.f32 %v3445_v54, %v1846_v4 }
 0x48b   : > { %1899 = vst.msk [vmem:[%s3456_s21 + $0x30] sm:$0xff] %vm3766_vm1, %v1883_v52  ;;  %v1884_v14 = vmax.f32 %v1868_v9, 0.0 }
 0x48d   : > { %1900 = vst.msk [vmem:[%s3456_s21 + $0x38] sm:$0xff] %vm3767_vm3, %v1884_v14 }
 0x4ae   : > { %v1807_v7 = vpop.permute.xlu0 %1806 }
 0x4af   : > { %v1847_v26 = vsel %vm1838_vm2, %v3386_v59, %v1807_v7  ;;  %v945_v59 = vsel %vm929_vm14, %v3436_v51, 1.0 }
 0x4b0   : > { %v1869_v33 = vadd.f32 %v3445_v54, %v1847_v26  ;;  %v1809_v32 = vpop.permute.xlu1 %1808  ;;  %2420 = vrcp.f32 %v945_v59 }
 0x4b1   : > { %v1848_v61 = vsel %vm1838_vm2, %v3389_v41, %v1809_v32  ;;  %2422 = vrcp.f32 %v946_v56 }
 0x4b2   : > { %v1885_v29 = vmax.f32 %v1869_v33, 0.0  ;;  %v1870_v27 = vadd.f32 %v3445_v54, %v1848_v61 }
 0x4b4   : > { %1901 = vst.msk [vmem:[%s3456_s21 + $0x40] sm:$0xff] %vm3768_vm9, %v1885_v29  ;;  %v1886_v17 = vmax.f32 %v1870_v27, 0.0 }
 0x4b6   : > { %1902 = vst.msk [vmem:[%s3456_s21 + $0x48] sm:$0xff] %vm3769_vm5, %v1886_v17  ;;  %v1811_v3 = vpop.permute.xlu0 %1810 }
 0x4b7   : > { %v1849_v41 = vsel %vm1838_vm2, %v3392_v1, %v1811_v3 }
 0x4b8   : > { %v1871_v11 = vadd.f32 %v3445_v54, %v1849_v41  ;;  %v1813_v46 = vpop.permute.xlu1 %1812 }
 0x4b9   : > { %v1850_v8 = vsel %vm1838_vm2, %v3395_v42, %v1813_v46 }
 0x4ba   : > { %v1887_v48 = vmax.f32 %v1871_v11, 0.0  ;;  %v1872_v51 = vadd.f32 %v3445_v54, %v1850_v8  ;;  %v2421_v18 = vpop.eup %2420 }
 0x4bb   : > { %v2423_v30 = vpop.eup %2422  ;;  %v1186_v38 = vmul.f32 %v2421_v18, %v3293_v40 }
 0x4bc   : > { %1903 = vst.msk [vmem:[%s3456_s21 + $0x50] sm:$0xff] %vm3770_vm4, %v1887_v48  ;;  %v1888_v6 = vmax.f32 %v1872_v51, 0.0  ;;  %v1187_v0 = vmul.f32 %v2423_v30, %v3295_v44 }
 0x4be   : > { %1904 = vst.msk [vmem:[%s3456_s21 + $0x58] sm:$0xff] %vm3771_vm6, %v1888_v6  ;;  %v1815_v20 = vpop.permute.xlu0 %1814 }
 0x4bf   : > { %v1851_v1 = vsel %vm1838_vm2, %v3398_v55, %v1815_v20 }
 0x4c0   : > { %v1873_v25 = vadd.f32 %v3445_v54, %v1851_v1  ;;  %v1817_v47 = vpop.permute.xlu1 %1816 }
 0x4c1   : > { %v1852_v42 = vsel %vm1838_vm2, %v3401_v35, %v1817_v47 }
 0x4c2   : > { %v1889_v63 = vmax.f32 %v1873_v25, 0.0  ;;  %v1874_v57 = vadd.f32 %v3445_v54, %v1852_v42 }
 0x4c4   : > { %1905 = vst.msk [vmem:[%s3456_s21 + $0x60] sm:$0xff] %vm3772_vm12, %v1889_v63  ;;  %v1890_v21 = vmax.f32 %v1874_v57, 0.0 }
 0x4c6   : > { %1906 = vst.msk [vmem:[%s3456_s21 + $0x68] sm:$0xff] %vm3773_vm13, %v1890_v21  ;;  %v1819_v55 = vpop.permute.xlu0 %1818 }
 0x4c7   : > { %v1853_v19 = vsel %vm1838_vm2, %v1186_v38, %v1819_v55 }
 0x4c8   : > { %v1875_v35 = vadd.f32 %v3445_v54, %v1853_v19  ;;  %v1821_v15 = vpop.permute.xlu1 %1820 }
 0x4c9   : > { %v1854_v49 = vsel %vm1838_vm2, %v1187_v0, %v1821_v15 }
 0x4ca   : > { %v1891_v2 = vmax.f32 %v1875_v35, 0.0  ;;  %v1876_v36 = vadd.f32 %v3445_v54, %v1854_v49 }
 0x4cc   : > { %1907 = vst.msk [vmem:[%s3456_s21 + $0x70] sm:$0xff] %vm3774_vm7, %v1891_v2  ;;  %v1892_v39 = vmax.f32 %v1876_v36, 0.0 }
 0x4ce   : > { %1908 = vst.msk [vmem:[%s3456_s21 + $0x78] sm:$0xff] %vm3775_vm8, %v1892_v39 }
 0x4cf PF: > { %s15_s18 = sadd.s32 1, %s2432_s18  }
 0x4d0   : > { %p12_p5 = scmp.ge.s32.totalorder %s15_s18, 4  }
 0x4d2   :  { %14 = sbr.rel (!%p12_p5) target bundleno = 1 (0x1), region = 73 }

</bundles_post_ra>
